<compile_context>
chip_gen: v6e
topology: v6e:2x2x1
jax: 0.10.0
libtpu: 0.0.40
codegen_flags: <defaults>
</compile_context>

<pallas_src>
import functools
import math

import jax
import jax.numpy as jnp
from jax.experimental import pallas as pl
from jax.experimental.pallas import tpu as pltpu

LANE = 128  # TPU lane width: pad feature dims to this for full MXU / unmasked stores


def _elu(x):
    # ELU(alpha=1): x if x > 0 else exp(x) - 1; clamp exp arg to avoid inf lanes.
    return jnp.where(x > 0, x, jnp.exp(jnp.minimum(x, 0.0)) - 1.0)


def _row_tile(n_pad):
    # Largest TM (multiple of 32, for int8 sublane tiling) dividing n_pad that keeps
    # the grid >= 2 steps: fills the MXU on v6e/v7x at larger N while keeping both
    # v7x TensorCores fed via the "parallel" grid axis.  Fall back to one full block.
    for tm in (256, 128, 64, 32):
        if n_pad % tm == 0 and n_pad // tm >= 2:
            return tm
    return n_pad


def _pad2_bf16(a, rows, cols):
    out = jnp.zeros((rows, cols), jnp.bfloat16)
    return out.at[: a.shape[0], : a.shape[1]].set(a.astype(jnp.bfloat16))


# ----------------------------------------------------------------------------
# Fused kernel: GIN aggregation + GIN MLP + ELU + score MLP, one row tile/step
# ----------------------------------------------------------------------------
def cut_fused_kernel(a_ref, x_ref, w1_ref, b1_ref, w2_ref, b2_ref,
                     ws1_ref, bs1_ref, ws2_ref, bs2_ref, o_ref):
    # GIN aggregation for this row tile: (A + I)[tile, :] @ x  (bf16 MXU, f32 acc).
    # int8 -> bf16 cast is VPU filler hidden under the A-tile DMA / MXU shadow.
    a = a_ref[...].astype(jnp.bfloat16)                # (TM, Np)
    x = x_ref[...]                                     # (Np, LANE) bf16, padded lanes 0
    agg = jnp.dot(a, x, preferred_element_type=jnp.float32)            # (TM, LANE) f32

    # GIN MLP([F, H, H]) with ELU between layers, then model-level ELU.
    h = _elu(jnp.dot(agg.astype(jnp.bfloat16), w1_ref[...],
                     preferred_element_type=jnp.float32) + b1_ref[...])
    h = jnp.dot(h.astype(jnp.bfloat16), w2_ref[...],
                preferred_element_type=jnp.float32) + b2_ref[...]
    h = _elu(h)                                        # (TM, LANE); cols >= H stay exactly 0

    # MaxCutPool score net: Linear(H,H) -> ELU -> Linear(H,1) -> tanh.
    # ws2/bs2 are lane-padded with their single live column at index `hidden`, so
    # s has the tanh score in column `hidden` and exact zeros elsewhere (tanh(0)=0).
    hs = _elu(jnp.dot(h.astype(jnp.bfloat16), ws1_ref[...],
                      preferred_element_type=jnp.float32) + bs1_ref[...])
    s = jnp.tanh(jnp.dot(hs.astype(jnp.bfloat16), ws2_ref[...],
                         preferred_element_type=jnp.float32) + bs2_ref[...])  # (TM, LANE)

    # h's column `hidden` is exactly 0 and s is 0 everywhere else -> exact packing.
    o_ref[...] = h + s                                 # one unmasked (TM, 128) f32 store


def cut_fused(adj_aug_i8, x_pad, w1, b1, w2, b2, ws1, bs1, ws2, bs2):
    n_pad = x_pad.shape[0]
    tm = _row_tile(n_pad)
    resident = lambda arr: pl.BlockSpec(arr.shape, lambda i: (0, 0))
    # TODO(synk): for very large N on v7x (64 MiB VMEM) add a column-chunk reduction
    # axis over Np with a VMEM f32 accumulator instead of a full (TM, Np) A tile.
    return pl.pallas_call(
        cut_fused_kernel,
        out_shape=jax.ShapeDtypeStruct((n_pad, LANE), jnp.float32),
        grid=(n_pad // tm,),
        in_specs=[
            pl.BlockSpec((tm, n_pad), lambda i: (i, 0)),  # streamed int8 adjacency row tile
            resident(x_pad),                              # node features (resident, bf16)
            resident(w1), resident(b1),                   # GIN MLP weights (resident, bf16)
            resident(w2), resident(b2),
            resident(ws1), resident(bs1),                 # score-net weights (resident, bf16)
            resident(ws2), resident(bs2),
        ],
        out_specs=pl.BlockSpec((tm, LANE), lambda i: (i, 0)),
        compiler_params=pltpu.CompilerParams(
            dimension_semantics=("parallel",),            # row tiles independent -> megacore
            vmem_limit_bytes=32 * 1024 * 1024),
    )(adj_aug_i8, x_pad, w1, b1, w2, b2, ws1, bs1, ws2, bs2)


# ----------------------------------------------------------------------------
# Full CutModel forward (glue in plain JAX, hot path in the fused Pallas kernel)
# ----------------------------------------------------------------------------
def cut_model_forward(params, x, edge_index, batch, pool_ratio=0.5):
    n, f_in = x.shape
    hidden = params["gin_w2"].shape[1]
    assert f_in <= LANE and hidden + 1 <= LANE

    src, dst = edge_index[0], edge_index[1]

    # Pad node count to a multiple of 128 so the (TM, Np) stream pipelines and the
    # (Np, 128) output stays lane-dense on every generation.  Padded rows/cols of A
    # and padded rows of x are zero; padded outputs are sliced off below.
    n_pad = ((n + LANE - 1) // LANE) * LANE

    # Densify edge_index directly in int8: A[i, j] = 1 iff edge j -> i, then fold the
    # GIN self-term (eps = 0): (A + I) @ x == A @ x + x.  Values 0/1/2 are exact.
    # TODO(synk): .set() dedupes parallel edges; PyG scatter-add would count multiplicities.
    adj_aug = jnp.zeros((n_pad, n_pad), jnp.int8).at[dst, src].set(1)
    idx = jnp.arange(n_pad)
    adj_aug = adj_aug.at[idx, idx].add(1)

    # Lane-pad features and weights to 128 in bf16 (zero pad); padded lanes stay 0.
    x_pad = _pad2_bf16(x, n_pad, LANE)
    w1 = _pad2_bf16(params["gin_w1"], LANE, LANE)
    b1 = _pad2_bf16(params["gin_b1"], 1, LANE)
    w2 = _pad2_bf16(params["gin_w2"], LANE, LANE)
    b2 = _pad2_bf16(params["gin_b2"], 1, LANE)
    ws1 = _pad2_bf16(params["score_w1"], LANE, LANE)
    bs1 = _pad2_bf16(params["score_b1"], 1, LANE)
    # Final score Linear(H,1): place its single live column at lane index `hidden`
    # so the kernel's `h + tanh(...)` packing is exact.
    ws2 = jnp.zeros((LANE, LANE), jnp.bfloat16).at[:hidden, hidden].set(
        params["score_w2"][:, 0].astype(jnp.bfloat16))
    bs2 = jnp.zeros((1, LANE), jnp.bfloat16).at[0, hidden].set(
        params["score_b2"][0, 0].astype(jnp.bfloat16))

    out = cut_fused(adj_aug, x_pad, w1, b1, w2, b2, ws1, bs1, ws2, bs2)
    out = out[:n]                                      # drop padded rows
    h = out[:, :hidden]                                # (N, H) GIN node features
    score = out[:, hidden:hidden + 1]                  # (N, 1) tanh scores

    # MaxCut auxiliary loss from the edge list: O(E), no second O(N^2) pass over A.
    # TODO(synk): verify sign convention of the relaxed MaxCut objective vs. reference impl.
    s = score[:, 0]
    aux_loss = jnp.mean(s[src] * s[dst])

    k = int(math.ceil(pool_ratio * n))
    _, kept_nodes = jax.lax.top_k(s, k)                # (k,) indices of kept nodes
    x_pool = h[kept_nodes] * score[kept_nodes]         # (k, H) gated pooled features

    # TODO(synk): per-graph top-k for multi-graph batches not modeled (single graph here).
    del batch
    return x_pool, kept_nodes, score, aux_loss


def init_params(key, in_channels, hidden_channels):
    ks = jax.random.split(key, 8)
    g = lambda k, shape: (0.1 * jax.random.normal(k, shape)).astype(jnp.float32)
    return {
        # GINConv MLP([in, hidden, hidden])
        "gin_w1": g(ks[0], (in_channels, hidden_channels)),
        "gin_b1": g(ks[1], (1, hidden_channels)),
        "gin_w2": g(ks[2], (hidden_channels, hidden_channels)),
        "gin_b2": g(ks[3], (1, hidden_channels)),
        # MaxCutPool score net MLP([hidden, hidden, 1])
        "score_w1": g(ks[4], (hidden_channels, hidden_channels)),
        "score_b1": g(ks[5], (1, hidden_channels)),
        "score_w2": g(ks[6], (hidden_channels, 1)),
        "score_b2": g(ks[7], (1, 1)),
    }


if __name__ == "__main__":
    key = jax.random.PRNGKey(0)
    N, F_IN, HIDDEN = 256, 8, 32

    k_x, k_p = jax.random.split(key, 2)
    x = jax.random.normal(k_x, (N, F_IN), dtype=jnp.float32)

    # Deterministic undirected graph: ring + skip-7 chords (no self-loops, no duplicates).
    idx = jnp.arange(N, dtype=jnp.int32)
    ring_dst = (idx + 1) % N
    chord_dst = (idx + 7) % N
    src = jnp.concatenate([idx, ring_dst, idx, chord_dst])
    dst = jnp.concatenate([ring_dst, idx, chord_dst, idx])
    edge_index = jnp.stack([src, dst]).astype(jnp.int32)

    batch = jnp.zeros((N,), dtype=jnp.int32)   # single graph
    params = init_params(k_p, F_IN, HIDDEN)

    x_pool, kept_nodes, score, aux_loss = cut_model_forward(
        params, x, edge_index, batch)
    jax.block_until_ready((x_pool, kept_nodes, score, aux_loss))

    K = math.ceil(0.5 * N)
    assert x_pool.shape == (K, HIDDEN)
    assert kept_nodes.shape == (K,)
    assert score.shape == (N, 1)
    assert aux_loss.shape == ()
    assert bool(jnp.all(jnp.isfinite(x_pool)))
    assert bool(jnp.all(jnp.isfinite(aux_loss)))
    print("KERNEL_OK")
</pallas_src>

<mosaic_0001>
module attributes {stable_mosaic.version = 11 : i64} {
  func.func @cut_fused_kernel(%arg0: i32, %arg1: memref<128x256xi8, #tpu.memory_space<vmem>>, %arg2: memref<256x128xbf16, #tpu.memory_space<vmem>>, %arg3: memref<128x128xbf16, #tpu.memory_space<vmem>>, %arg4: memref<1x128xbf16, #tpu.memory_space<vmem>>, %arg5: memref<128x128xbf16, #tpu.memory_space<vmem>>, %arg6: memref<1x128xbf16, #tpu.memory_space<vmem>>, %arg7: memref<128x128xbf16, #tpu.memory_space<vmem>>, %arg8: memref<1x128xbf16, #tpu.memory_space<vmem>>, %arg9: memref<128x128xbf16, #tpu.memory_space<vmem>>, %arg10: memref<1x128xbf16, #tpu.memory_space<vmem>>, %arg11: memref<128x128xf32, #tpu.memory_space<vmem>>) attributes {dimension_semantics = [#tpu.dimension_semantics<parallel>], iteration_bounds = array<i64: 2>, scalar_prefetch = 0 : i64, scratch_operands = 0 : i64, tpu.core_type = #tpu.core_type<tc>, window_params = [{transform_indices = @transform_0, window_bounds = array<i64: 128, 256>}, {pipeline_mode = #tpu.pipeline_mode<synchronous>, transform_indices = @transform_1, window_bounds = array<i64: 256, 128>}, {pipeline_mode = #tpu.pipeline_mode<synchronous>, transform_indices = @transform_2, window_bounds = array<i64: 128, 128>}, {pipeline_mode = #tpu.pipeline_mode<synchronous>, transform_indices = @transform_3, window_bounds = array<i64: 1, 128>}, {pipeline_mode = #tpu.pipeline_mode<synchronous>, transform_indices = @transform_4, window_bounds = array<i64: 128, 128>}, {pipeline_mode = #tpu.pipeline_mode<synchronous>, transform_indices = @transform_5, window_bounds = array<i64: 1, 128>}, {pipeline_mode = #tpu.pipeline_mode<synchronous>, transform_indices = @transform_6, window_bounds = array<i64: 128, 128>}, {pipeline_mode = #tpu.pipeline_mode<synchronous>, transform_indices = @transform_7, window_bounds = array<i64: 1, 128>}, {pipeline_mode = #tpu.pipeline_mode<synchronous>, transform_indices = @transform_8, window_bounds = array<i64: 128, 128>}, {pipeline_mode = #tpu.pipeline_mode<synchronous>, transform_indices = @transform_9, window_bounds = array<i64: 1, 128>}, {transform_indices = @transform_10, window_bounds = array<i64: 128, 128>}]} {
    %c0 = arith.constant 0 : index
    %c0_0 = arith.constant 0 : index
    %0 = vector.load %arg1[%c0, %c0_0] : memref<128x256xi8, #tpu.memory_space<vmem>>, vector<128x256xi8>
    %1 = arith.sitofp %0 : vector<128x256xi8> to vector<128x256xbf16>
    %c0_1 = arith.constant 0 : index
    %c0_2 = arith.constant 0 : index
    %2 = vector.load %arg2[%c0_1, %c0_2] : memref<256x128xbf16, #tpu.memory_space<vmem>>, vector<256x128xbf16>
    %cst = arith.constant dense<0.000000e+00> : vector<128x128xf32>
    %3 = tpu.matmul %1, %2, %cst {dimension_numbers = #tpu.dot_dimension_numbers<[1], [0], [0], [1], [0, 0, 1, 1], [], []>} : vector<128x256xbf16>, vector<256x128xbf16>, vector<128x128xf32> -> vector<128x128xf32>
    %4 = arith.truncf %3 : vector<128x128xf32> to vector<128x128xbf16>
    %c0_3 = arith.constant 0 : index
    %c0_4 = arith.constant 0 : index
    %5 = vector.load %arg3[%c0_3, %c0_4] : memref<128x128xbf16, #tpu.memory_space<vmem>>, vector<128x128xbf16>
    %cst_5 = arith.constant dense<0.000000e+00> : vector<128x128xf32>
    %6 = tpu.matmul %4, %5, %cst_5 {dimension_numbers = #tpu.dot_dimension_numbers<[1], [0], [0], [1], [0, 0, 1, 1], [], []>} : vector<128x128xbf16>, vector<128x128xbf16>, vector<128x128xf32> -> vector<128x128xf32>
    %c0_6 = arith.constant 0 : index
    %c0_7 = arith.constant 0 : index
    %7 = vector.load %arg4[%c0_6, %c0_7] : memref<1x128xbf16, #tpu.memory_space<vmem>>, vector<1x128xbf16>
    %8 = arith.extf %7 : vector<1x128xbf16> to vector<1x128xf32>
    %9 = vector.broadcast %8 : vector<1x128xf32> to vector<128x128xf32>
    %10 = arith.addf %6, %9 : vector<128x128xf32>
    %cst_8 = arith.constant 0.000000e+00 : f32
    %11 = vector.broadcast %cst_8 : f32 to vector<128x128xf32>
    %12 = arith.cmpf ogt, %10, %11 : vector<128x128xf32>
    %cst_9 = arith.constant 0.000000e+00 : f32
    %13 = vector.broadcast %cst_9 : f32 to vector<128x128xf32>
    %14 = arith.minimumf %10, %13 : vector<128x128xf32>
    %15 = math.exp %14 : vector<128x128xf32>
    %cst_10 = arith.constant 1.000000e+00 : f32
    %16 = vector.broadcast %cst_10 : f32 to vector<128x128xf32>
    %17 = arith.subf %15, %16 : vector<128x128xf32>
    %18 = arith.select %12, %10, %17 : vector<128x128xi1>, vector<128x128xf32>
    %19 = arith.truncf %18 : vector<128x128xf32> to vector<128x128xbf16>
    %c0_11 = arith.constant 0 : index
    %c0_12 = arith.constant 0 : index
    %20 = vector.load %arg5[%c0_11, %c0_12] : memref<128x128xbf16, #tpu.memory_space<vmem>>, vector<128x128xbf16>
    %cst_13 = arith.constant dense<0.000000e+00> : vector<128x128xf32>
    %21 = tpu.matmul %19, %20, %cst_13 {dimension_numbers = #tpu.dot_dimension_numbers<[1], [0], [0], [1], [0, 0, 1, 1], [], []>} : vector<128x128xbf16>, vector<128x128xbf16>, vector<128x128xf32> -> vector<128x128xf32>
    %c0_14 = arith.constant 0 : index
    %c0_15 = arith.constant 0 : index
    %22 = vector.load %arg6[%c0_14, %c0_15] : memref<1x128xbf16, #tpu.memory_space<vmem>>, vector<1x128xbf16>
    %23 = arith.extf %22 : vector<1x128xbf16> to vector<1x128xf32>
    %24 = vector.broadcast %23 : vector<1x128xf32> to vector<128x128xf32>
    %25 = arith.addf %21, %24 : vector<128x128xf32>
    %cst_16 = arith.constant 0.000000e+00 : f32
    %26 = vector.broadcast %cst_16 : f32 to vector<128x128xf32>
    %27 = arith.cmpf ogt, %25, %26 : vector<128x128xf32>
    %cst_17 = arith.constant 0.000000e+00 : f32
    %28 = vector.broadcast %cst_17 : f32 to vector<128x128xf32>
    %29 = arith.minimumf %25, %28 : vector<128x128xf32>
    %30 = math.exp %29 : vector<128x128xf32>
    %cst_18 = arith.constant 1.000000e+00 : f32
    %31 = vector.broadcast %cst_18 : f32 to vector<128x128xf32>
    %32 = arith.subf %30, %31 : vector<128x128xf32>
    %33 = arith.select %27, %25, %32 : vector<128x128xi1>, vector<128x128xf32>
    %34 = arith.truncf %33 : vector<128x128xf32> to vector<128x128xbf16>
    %c0_19 = arith.constant 0 : index
    %c0_20 = arith.constant 0 : index
    %35 = vector.load %arg7[%c0_19, %c0_20] : memref<128x128xbf16, #tpu.memory_space<vmem>>, vector<128x128xbf16>
    %cst_21 = arith.constant dense<0.000000e+00> : vector<128x128xf32>
    %36 = tpu.matmul %34, %35, %cst_21 {dimension_numbers = #tpu.dot_dimension_numbers<[1], [0], [0], [1], [0, 0, 1, 1], [], []>} : vector<128x128xbf16>, vector<128x128xbf16>, vector<128x128xf32> -> vector<128x128xf32>
    %c0_22 = arith.constant 0 : index
    %c0_23 = arith.constant 0 : index
    %37 = vector.load %arg8[%c0_22, %c0_23] : memref<1x128xbf16, #tpu.memory_space<vmem>>, vector<1x128xbf16>
    %38 = arith.extf %37 : vector<1x128xbf16> to vector<1x128xf32>
    %39 = vector.broadcast %38 : vector<1x128xf32> to vector<128x128xf32>
    %40 = arith.addf %36, %39 : vector<128x128xf32>
    %cst_24 = arith.constant 0.000000e+00 : f32
    %41 = vector.broadcast %cst_24 : f32 to vector<128x128xf32>
    %42 = arith.cmpf ogt, %40, %41 : vector<128x128xf32>
    %cst_25 = arith.constant 0.000000e+00 : f32
    %43 = vector.broadcast %cst_25 : f32 to vector<128x128xf32>
    %44 = arith.minimumf %40, %43 : vector<128x128xf32>
    %45 = math.exp %44 : vector<128x128xf32>
    %cst_26 = arith.constant 1.000000e+00 : f32
    %46 = vector.broadcast %cst_26 : f32 to vector<128x128xf32>
    %47 = arith.subf %45, %46 : vector<128x128xf32>
    %48 = arith.select %42, %40, %47 : vector<128x128xi1>, vector<128x128xf32>
    %49 = arith.truncf %48 : vector<128x128xf32> to vector<128x128xbf16>
    %c0_27 = arith.constant 0 : index
    %c0_28 = arith.constant 0 : index
    %50 = vector.load %arg9[%c0_27, %c0_28] : memref<128x128xbf16, #tpu.memory_space<vmem>>, vector<128x128xbf16>
    %cst_29 = arith.constant dense<0.000000e+00> : vector<128x128xf32>
    %51 = tpu.matmul %49, %50, %cst_29 {dimension_numbers = #tpu.dot_dimension_numbers<[1], [0], [0], [1], [0, 0, 1, 1], [], []>} : vector<128x128xbf16>, vector<128x128xbf16>, vector<128x128xf32> -> vector<128x128xf32>
    %c0_30 = arith.constant 0 : index
    %c0_31 = arith.constant 0 : index
    %52 = vector.load %arg10[%c0_30, %c0_31] : memref<1x128xbf16, #tpu.memory_space<vmem>>, vector<1x128xbf16>
    %53 = arith.extf %52 : vector<1x128xbf16> to vector<1x128xf32>
    %54 = vector.broadcast %53 : vector<1x128xf32> to vector<128x128xf32>
    %55 = arith.addf %51, %54 : vector<128x128xf32>
    %56 = math.tanh %55 : vector<128x128xf32>
    %57 = arith.addf %33, %56 : vector<128x128xf32>
    %c0_32 = arith.constant 0 : index
    %c0_33 = arith.constant 0 : index
    %58 = vector.load %arg11[%c0_32, %c0_33] : memref<128x128xf32, #tpu.memory_space<vmem>>, vector<128x128xf32>
    tpu.vector_store %arg11[%c0_32, %c0_33], %57 {strides = array<i32>} : memref<128x128xf32, #tpu.memory_space<vmem>>, vector<128x128xf32>,
    return
  }
  func.func @transform_0(%arg0: i32) -> (i32, i32) {
    %c0_i32 = arith.constant 0 : i32
    %c0_i32_0 = arith.constant 0 : i32
    return %arg0, %c0_i32 : i32, i32
  }
  func.func @transform_1(%arg0: i32) -> (i32, i32) {
    %c0_i32 = arith.constant 0 : i32
    %c0_i32_0 = arith.constant 0 : i32
    %c0_i32_1 = arith.constant 0 : i32
    return %c0_i32, %c0_i32_0 : i32, i32
  }
  func.func @transform_2(%arg0: i32) -> (i32, i32) {
    %c0_i32 = arith.constant 0 : i32
    %c0_i32_0 = arith.constant 0 : i32
    %c0_i32_1 = arith.constant 0 : i32
    return %c0_i32, %c0_i32_0 : i32, i32
  }
  func.func @transform_3(%arg0: i32) -> (i32, i32) {
    %c0_i32 = arith.constant 0 : i32
    %c0_i32_0 = arith.constant 0 : i32
    %c0_i32_1 = arith.constant 0 : i32
    return %c0_i32, %c0_i32_0 : i32, i32
  }
  func.func @transform_4(%arg0: i32) -> (i32, i32) {
    %c0_i32 = arith.constant 0 : i32
    %c0_i32_0 = arith.constant 0 : i32
    %c0_i32_1 = arith.constant 0 : i32
    return %c0_i32, %c0_i32_0 : i32, i32
  }
  func.func @transform_5(%arg0: i32) -> (i32, i32) {
    %c0_i32 = arith.constant 0 : i32
    %c0_i32_0 = arith.constant 0 : i32
    %c0_i32_1 = arith.constant 0 : i32
    return %c0_i32, %c0_i32_0 : i32, i32
  }
  func.func @transform_6(%arg0: i32) -> (i32, i32) {
    %c0_i32 = arith.constant 0 : i32
    %c0_i32_0 = arith.constant 0 : i32
    %c0_i32_1 = arith.constant 0 : i32
    return %c0_i32, %c0_i32_0 : i32, i32
  }
  func.func @transform_7(%arg0: i32) -> (i32, i32) {
    %c0_i32 = arith.constant 0 : i32
    %c0_i32_0 = arith.constant 0 : i32
    %c0_i32_1 = arith.constant 0 : i32
    return %c0_i32, %c0_i32_0 : i32, i32
  }
  func.func @transform_8(%arg0: i32) -> (i32, i32) {
    %c0_i32 = arith.constant 0 : i32
    %c0_i32_0 = arith.constant 0 : i32
    %c0_i32_1 = arith.constant 0 : i32
    return %c0_i32, %c0_i32_0 : i32, i32
  }
  func.func @transform_9(%arg0: i32) -> (i32, i32) {
    %c0_i32 = arith.constant 0 : i32
    %c0_i32_0 = arith.constant 0 : i32
    %c0_i32_1 = arith.constant 0 : i32
    return %c0_i32, %c0_i32_0 : i32, i32
  }
  func.func @transform_10(%arg0: i32) -> (i32, i32) {
    %c0_i32 = arith.constant 0 : i32
    %c0_i32_0 = arith.constant 0 : i32
    return %arg0, %c0_i32 : i32, i32
  }
}

</mosaic_0001>

<bundles_post_ra>
// kernel: tpu_custom_call.1
= control target key start
LH: loop header
LB: loop body
LE: loop exit
PB: predicated region body
PF: predicated region fallthrough
CT: control target
= control target key end

     0   :  { %s3343_s0 = inlined_call_operand.hbm [shape: s8[256,256], index: 0, kind: input, shape index: {}]   ;;  %s3344_s1 = inlined_call_operand.hbm [shape: bf16[256,128], index: 1, kind: input, shape index: {}]   ;;  %s3345_s2 = inlined_call_operand.hbm [shape: bf16[128,128], index: 2, kind: input, shape index: {}]   ;;  %s3346_s3 = inlined_call_operand.vmem [shape: bf16[1,128], index: 3, kind: input, shape index: {}]   ;;  %s3347_s4 = inlined_call_operand.hbm [shape: bf16[128,128], index: 4, kind: input, shape index: {}]   ;;  %s3348_s5 = inlined_call_operand.vmem [shape: bf16[1,128], index: 5, kind: input, shape index: {}]   ;;  %s3349_s6 = inlined_call_operand.hbm [shape: bf16[128,128], index: 6, kind: input, shape index: {}]   ;;  %s3350_s7 = inlined_call_operand.vmem [shape: bf16[1,128], index: 7, kind: input, shape index: {}]   ;;  %s3351_s8 = inlined_call_operand.hbm [shape: bf16[128,128], index: 8, kind: input, shape index: {}]   ;;  %s3352_s9 = inlined_call_operand.vmem [shape: bf16[1,128], index: 9, kind: input, shape index: {}]   ;;  %s3353_s10 = inlined_call_operand.hbm [shape: f32[256,128], index: 10, kind: output, shape index: {}]  }
   0x1   :  { %3358 = sst [smem:[#allocation19_spill]] %s3344_s1 }
   0x2   :  { %3359 = sst [smem:[#allocation20_spill]] %s3345_s2 }
   0x3   :  { %3360 = sst [smem:[#allocation21_spill]] %s3347_s4 }
   0x4   :  { %3361 = sst [smem:[#allocation22_spill]] %s3349_s6 }
   0x5   :  { %15 = vsyncpa [#allocation3], 0 }
   0x6   :  { %17 = vsyncpa [#allocation3 + $0x1], 0 }
   0x7   :  { %18 = vsyncpa [#allocation6], 0 }
   0x8   :  { %19 = vsyncpa [#allocation9], 0 }
   0x9   :  { %20 = vsyncpa [#allocation12], 0 }
   0xa   :  { %21 = vsyncpa [#allocation4], 0 }
   0xb   :  { %23 = vsyncpa [#allocation4 + $0x1], 0  ;;  %s2838_s13 = smov 0   ;;  %s2840_s14 = smov 0  }
   0xc   :  { %s2842_s15 = smov 0   ;;  %s2844_s16 = smov 0  }
   0xd LB: > { %s2770_s17 = smov [#allocation5]   ;;  %s2859_s19 = sadd.s32 4294967295, %s2768_s16   ;;  %s2768_s16 = sphi %s2844_s16, %s3387_s16   ;;  %s2764_s15 = sphi %s2842_s15, %s3386_s15   ;;  %s2760_s14 = sphi %s2840_s14, %s3385_s14   ;;  %s2756_s13 = sphi %s2838_s13, %s3384_s13  }
   0xe   : > { %s287_s18 = sshll.u32 %s2770_s17, 4  ;;  %p1876_p0 = scmp.ge.s32.totalorder %s2768_s16, 1  ;;  %s288_s18 = int_to_ptr.vmem [resolvable:$true] %s287_s18 }
   0xf   : > { %p3354_p1 = scmp.eq.s32.totalorder %s2859_s19, 0  ;;  %p275_p2 = scmp.lt.s32.totalorder %s2768_s16, 3 }
  0x10   : > { %s2771_s21 = smov [#allocation8]   ;;  %s2772_s24 = smov [#allocation7]  }
  0x11   : > { %p2864_p3 = pnand %p1876_p0, %p275_p2  ;;  %s316_s22 = sshll.u32 %s2771_s21, 4  ;;  %s2877_s22 = int_to_ptr.vmem [resolvable:$true] %s316_s22 }
  0x12   : > { %s300_s25 = sshll.u32 %s2772_s24, 4  ;;  %s2545_s27 = scalar_lea.vmem %s288_s18, 2048  ;;  %s2879_s25 = int_to_ptr.vmem [resolvable:$true] %s300_s25 }
  0x13   : > { %s3362_s20 = scalar_select %p2864_p3, 1, 0 }
  0x14   : > { %p2279_p5 = pneg %p2864_p3  ;;  %p2546_p8 = scmp.ne.s32.totalorder %s288_s18, %s2545_s27 }
  0x15   : > { %p2553_p11 = scmp.lt.s32.totalorder %s288_s18, %s288_s18  ;;  %p2554_p12 = scmp.lt.s32.totalorder %s2545_s27, %s2545_s27 }
  0x16   : > { %p2873_p6 = pnand %p2279_p5, %p3354_p1 }
  0x17   : > { %p2555_p13 = por %p2554_p12, %p2553_p11 }
  0x18   : > { %p2883_p7 = pneg %p2873_p6 }
  0x1a   : > { %p2548_p9 = pnand %p2546_p8, %p2883_p7 }
  0x1c   : > { %p2549_p10 = pneg %p2548_p9 }
  0x1e   : > { %p2556_p0 = pnand %p2555_p13, %p2549_p10 }
  0x20   : > { %2559 = shalt.err (!%p2556_p0)
}
  0x21   : > { %s2773_s28 = smov 64   ;;  %s2774_s29 = smov 4  }
  0x22   : > { %s3365_s1 = sld [smem:[#allocation19_spill]]  ;;  %s2571_s12 = scalar_lea.vmem %s2877_s22, 1024 }
  0x23   : > { %p2572_p2 = scmp.ne.s32.totalorder %s2877_s22, %s2571_s12  ;;  %p2579_p9 = scmp.lt.s32.totalorder %s2877_s22, %s2877_s22 }
  0x24   : > { %p2580_p10 = scmp.lt.s32.totalorder %s2571_s12, %s2571_s12 }
  0x25   : > { %p2574_p5 = pnand %p2572_p2, %p2883_p7 }
  0x26   : > { %p2581_p11 = por %p2580_p10, %p2579_p9 }
  0x27   : > { %p2575_p8 = pneg %p2574_p5 }
  0x28   : > { %2282 = dma.hbm_to_vmem [thread:$0]  (!%p2873_p6), %s3365_s1, 2048, %s288_s18, [#allocation6], %s2773_s28, %s2773_s28, %s2774_s29  }
  0x29   : > { %p2582_p12 = pnand %p2581_p11, %p2575_p8 }
  0x2b   : > { %2585 = shalt.err (!%p2582_p12)
}
  0x2c   : > { %s3366_s4 = sld [smem:[#allocation21_spill]]  ;;  %s2597_s18 = scalar_lea.vmem %s2879_s25, 1024 }
  0x2d   : > { %p2598_p13 = scmp.ne.s32.totalorder %s2879_s25, %s2597_s18  ;;  %p2605_p5 = scmp.lt.s32.totalorder %s2879_s25, %s2879_s25 }
  0x2e   : > { %p2606_p8 = scmp.lt.s32.totalorder %s2597_s18, %s2597_s18 }
  0x2f   : > { %p2600_p0 = pnand %p2598_p13, %p2883_p7 }
  0x30   : > { %p2607_p9 = por %p2606_p8, %p2605_p5 }
  0x31   : > { %p2601_p2 = pneg %p2600_p0 }
  0x32   : > { %2288 = dma.hbm_to_vmem [thread:$0]  (!%p2873_p6), %s3366_s4, 1024, %s2877_s22, [#allocation9], %s2773_s28, %s2773_s28, %s2774_s29  }
  0x33   : > { %p2608_p10 = pnand %p2607_p9, %p2601_p2 }
  0x35   : > { %2611 = shalt.err (!%p2608_p10)
}
  0x36   : > { %s3367_s2 = sld [smem:[#allocation20_spill]]  ;;  %s2775_s22 = smov [#allocation10]  }
  0x37   : > { %s332_s30 = sshll.u32 %s2775_s22, 4  ;;  %s2776_s11 = smov [#allocation11]   ;;  %s333_s30 = int_to_ptr.vmem [resolvable:$true] %s332_s30 }
  0x38   : > { %s348_s12 = sshll.u32 %s2776_s11, 4  ;;  %s2623_s17 = scalar_lea.vmem %s333_s30, 1024  ;;  %s349_s12 = int_to_ptr.vmem [resolvable:$true] %s348_s12 }
  0x39   : > { %p2624_p11 = scmp.ne.s32.totalorder %s333_s30, %s2623_s17  ;;  %p2631_p0 = scmp.lt.s32.totalorder %s333_s30, %s333_s30 }
  0x3a   : > { %p2632_p2 = scmp.lt.s32.totalorder %s2623_s17, %s2623_s17 }
  0x3b   : > { %p2626_p12 = pnand %p2624_p11, %p2883_p7 }
  0x3c   : > { %2285 = dma.hbm_to_vmem [thread:$0]  (!%p2873_p6), %s3367_s2, 1024, %s2879_s25, [#allocation6], %s2773_s28, %s2773_s28, %s2774_s29  }
  0x3d   : > { %p2627_p13 = pneg %p2626_p12  ;;  %p2633_p5 = por %p2632_p2, %p2631_p0 }
  0x3f   : > { %p2634_p8 = pnand %p2633_p5, %p2627_p13 }
  0x41   : > { %2637 = shalt.err (!%p2634_p8)
}
  0x42   : > { %s3368_s6 = sld [smem:[#allocation22_spill]]  ;;  %s2649_s18 = scalar_lea.vmem %s349_s12, 1024 }
  0x43   : > { %p2650_p9 = scmp.ne.s32.totalorder %s349_s12, %s2649_s18  ;;  %p2657_p12 = scmp.lt.s32.totalorder %s349_s12, %s349_s12 }
  0x44   : > { %p2658_p0 = scmp.lt.s32.totalorder %s2649_s18, %s2649_s18 }
  0x45   : > { %p2652_p10 = pnand %p2650_p9, %p2883_p7 }
  0x46   : > { %p2659_p13 = por %p2658_p0, %p2657_p12 }
  0x47   : > { %p2653_p11 = pneg %p2652_p10 }
  0x48   : > { %2291 = dma.hbm_to_vmem [thread:$0]  (!%p2873_p6), %s3368_s6, 1024, %s333_s30, [#allocation9], %s2773_s28, %s2773_s28, %s2774_s29  }
  0x49   : > { %p2660_p2 = pnand %p2659_p13, %p2653_p11 }
  0x4b   : > { %2663 = shalt.err (!%p2660_p2)
}
  0x4c   : > { %2294 = dma.hbm_to_vmem [thread:$0]  (!%p2873_p6), %s3351_s8, 1024, %s349_s12, [#allocation12], %s2773_s28, %s2773_s28, %s2774_s29  }
  0x4d   : > { %s1875_s23 = sadd.s32 4294967294, %s2768_s16   ;;  %s2949_s26 = sadd.s32 1, %s2768_s16  }
  0x4e   : > { %s36_s22 = sadd.s32 1, %s2764_s15  ;;  %s33_s30 = ssub.s32 %s2768_s16, %s2949_s26 }
  0x4f   : > { %p43_p7 = scmp.ne.s32.totalorder %s2764_s15, %s2760_s14  ;;  %p34_p5 = scmp.eq.s32.totalorder %s33_s30, 0 }
  0x50   : > { %p44_p8 = scmp.eq.s32.totalorder %s2768_s16, 0  ;;  %p49_p9 = scmp.ne.s32.totalorder %s2760_s14, %s2756_s13 }
  0x51   : > { %p262_p10 = scmp.eq.s32.totalorder %s2859_s19, 1  ;;  %p268_p0 = scmp.eq.s32.totalorder %s1875_s23, 1 }
  0x52   : > { %s2961_s11 = scalar_select %p34_p5, %s2764_s15, %s36_s22  }
  0x53   : > { %p45_p11 = por %p44_p8, %p43_p7  ;;  %p2965_p12 = por %p3354_p1, %p49_p9 }
  0x54   : > { %p2969_p6 = por %p262_p10, %p43_p7  ;;  %p2308_p13 = scmp.lt.s32.totalorder %s2768_s16, 2 }
  0x55   : > { %s3369_s17 = scalar_select %p2965_p12, 1, 0 }
  0x56   : > { %s3370_s28 = scalar_select %p2969_p6, 1, 0 }
  0x57   : > { %s365_s29 = sand.u32 1, %s2764_s15   ;;  %p2975_p2 = por %p268_p0, %p49_p9 }
  0x58   : > { %s1883_s25 = sshll.u32 %s365_s29, 6  ;;  %s1997_s21 = sshll.u32 %s2768_s16, 10 }
  0x59   : > { %s3371_s12 = scalar_select %p2975_p2, 1, 0 }
  0x5a   : > { %s2983_s27 = scalar_lea.hbm %s3343_s0, %s1997_s21  ;;  %s369_s22 = scalar_lea.vmem [#allocation2], %s1883_s25 }
  0x5b   : > { %s377_s30 = sshll.u32 %s369_s22, 4  ;;  %p2985_p7 = pnand %p2308_p13, %p45_p11  ;;  %s2989_s30 = int_to_ptr.vmem [resolvable:$true] %s377_s30 }
  0x5c   : > { %s2991_s1 = scalar_lea.sflag [#allocation3], %s365_s29  ;;  %s2664_s2 = scalar_lea.hbm %s2983_s27, 1024 }
  0x5d   : > { %p2665_p5 = scmp.ne.s32.totalorder %s2983_s27, %s2664_s2  ;;  %p2666_p8 = pneg %p2985_p7 }
  0x5e   : > { %s2669_s25 = scalar_lea.hbm %s3343_s0, 2048  ;;  %p2670_p11 = scmp.lt.s32.totalorder %s2983_s27, %s3343_s0 }
  0x5f   : > { %p2667_p9 = pnand %p2666_p8, %p2665_p5  ;;  %p2671_p0 = scmp.lt.s32.totalorder %s2669_s25, %s2664_s2 }
  0x61   : > { %p2668_p10 = pneg %p2667_p9  ;;  %p2672_p13 = por %p2671_p0, %p2670_p11 }
  0x63   : > { %p2673_p4 = pnand %p2672_p13, %p2668_p10 }
  0x65   : > { %2676 = shalt.err (!%p2673_p4)
}
  0x66   : > { %s2677_s29 = scalar_lea.vmem %s2989_s30, 1024  ;;  %s2777_s4 = smov [#allocation2]  }
  0x67   : > { %p2678_p1 = scmp.ne.s32.totalorder %s2989_s30, %s2677_s29  ;;  %s2682_s6 = sshll.u32 %s2777_s4, 4  ;;  %s2683_s6 = int_to_ptr.vmem [resolvable:$false] %s2682_s6 }
  0x68   : > { %s2684_s21 = scalar_lea.vmem %s2683_s6, 2048  ;;  %p2685_p9 = scmp.lt.s32.totalorder %s2989_s30, %s2683_s6 }
  0x69   : > { %p2680_p2 = pnand %p2678_p1, %p2666_p8  ;;  %p2686_p6 = scmp.lt.s32.totalorder %s2684_s21, %s2677_s29 }
  0x6b   : > { %p2681_p5 = pneg %p2680_p2  ;;  %p2687_p12 = por %p2686_p6, %p2685_p9 }
  0x6d   : > { %p2688_p3 = pnand %p2687_p12, %p2681_p5 }
  0x6f   : > { %2691 = shalt.err (!%p2688_p3)
}
  0x70   : > { %s2778_s2 = smov 256   ;;  %s2779_s18 = smov 16  }
  0x71   : > { %2298 = dma.hbm_to_vmem [thread:$0]  (!%p2985_p7), %s2983_s27, 1024, %s2989_s30, %s2991_s1, %s2778_s2, %s2778_s2, %s2779_s18  }
  0x72   : > { %p3373_p1 = scmp.ne.s32.totalorder %s3362_s20, 0 }
  0x73   : > { %s3015_s4 = sand.u32 (!%p3373_p1), 1, %s2760_s14   ;;  %p3374_p3 = scmp.ne.s32.totalorder (!%p3373_p1), %s3369_s17, 0 }
  0x74   : > { %389 = sbr.rel (%p3373_p1) target bundleno = 1330 (0x532), region = 60  ;;  %s1888_s6 = sshll.u32 (!%p3373_p1), %s3015_s4, 6 }
  0x75   : > { %s392_s25 = scalar_lea.sflag (!%p3373_p1), [#allocation3], %s3015_s4  ;;  %s3019_s24 = scalar_lea.vmem (!%p3373_p1), [#allocation2], %s1888_s6 }
  0x79   : > { %2735 = dma.done.wait (%p3374_p3), %s392_s25, 1024  }
  0x7a   : > { %2737 = vsyncadd (%p3374_p3), %s392_s25, 4294966272  ;;  %p3375_p4 = scmp.eq.s32.totalorder %s2859_s19, 0 }
  0x7c   : > { %2739 = dma.done.wait (%p3375_p4), [#allocation6], 3072   ;;  %p3376_p12 = pmov %p3375_p4 }
  0x7d   : > { %p3377_p6 = pmov %p3375_p4 }
  0x7e   : > { %2741 = vsyncadd (%p3376_p12), [#allocation6], 4294964224 }
  0x7f   : > { %2743 = dma.done.wait (%p3377_p6), [#allocation9], 2048   ;;  %p3378_p2 = pmov %p3375_p4 }
  0x81   : > { %2745 = vsyncadd (%p3378_p2), [#allocation9], 4294965248  ;;  %p3379_p7 = pmov %p3378_p2 }
  0x82   : > { %p3380_p8 = pmov %p3378_p2 }
  0x83   : > { %2747 = dma.done.wait (%p3379_p7), [#allocation12], 1024  }
  0x84   : > { %2749 = vsyncadd (%p3380_p8), [#allocation12], 4294966272  ;;  %v2358_v0 = vld [vmem:[#allocation5 + $0x78] sm:$0xff]   ;;  %v2360_v2 = vld [vmem:[#allocation5 + $0x70] sm:$0xff]   ;;  %s1894_s21 = sshll.u32 %s3015_s4, 7  ;;  %s1998_s18 = sshll.u32 %s2859_s19, 11 }
  0x85   : > { %v2359_v1 = vld [vmem:[#allocation5 + $0x38] sm:$0xff]   ;;  %1999 = vmatprep.subr.bf16.mxu0 %v2358_v0  ;;  %v2361_v3 = vld [vmem:[#allocation5 + $0x30] sm:$0xff]   ;;  %v2362_v4 = vld [vmem:[#allocation5 + $0x68] sm:$0xff]   ;;  %s3250_s2 = scalar_lea.vmem [#allocation13], %s1894_s21  ;;  %s3295_s1 = scalar_lea.hbm %s3353_s10, %s1998_s18 }
  0x86   : > { %2000 = vmatpush3.bf16.msra.mxu0 %v2359_v1  ;;  %v2363_v5 = vld [vmem:[#allocation5 + $0x28] sm:$0xff]   ;;  %v2364_v6 = vld [vmem:[#allocation5 + $0x60] sm:$0xff]   ;;  %v2366_v8 = vld [vmem:[#allocation5 + $0x58] sm:$0xff]   ;;  %s1754_s6 = sshll.u32 %s3250_s2, 4  ;;  %s1741_s19 = scalar_lea.sflag [#allocation4], %s3015_s4  ;;  %s3297_s6 = int_to_ptr.vmem [resolvable:$true] %s1754_s6 }
  0x87   : > { %2001 = vmatprep.subr.bf16.mxu0 %v2360_v2  ;;  %v2365_v7 = vld [vmem:[#allocation5 + $0x20] sm:$0xff]   ;;  %v2367_v9 = vld [vmem:[#allocation5 + $0x18] sm:$0xff]   ;;  %v2368_v10 = vld [vmem:[#allocation5 + $0x50] sm:$0xff]   ;;  %s2692_s20 = scalar_lea.vmem %s3297_s6, 2048  ;;  %p3381_p11 = scmp.ne.s32.totalorder %s3370_s28, 0 }
  0x88   : > { %v456_v11 = vld [vmem:[%s3019_s24 + $0x8] sm:$0xff]  ;;  %v2369_v13 = vld [vmem:[#allocation5 + $0x10] sm:$0xff]   ;;  %v2374_v15 = vld [vmem:[#allocation7 + $0x38] sm:$0xff]   ;;  %p2693_p10 = scmp.ne.s32.totalorder %s3297_s6, %s2692_s20  ;;  %s2780_s17 = smov [#allocation13]  }
  0x89   : > { %v464_v12 = vunpack.c.l.s8.bf16 %v456_v11  ;;  %v2370_v14 = vld [vmem:[#allocation5 + $0x48] sm:$0xff]   ;;  %v2375_v16 = vld [vmem:[#allocation7 + $0x30] sm:$0xff]   ;;  %2127 = vmatprep.subr.bf16.mxu1 %v2374_v15  ;;  %v2372_v18 = vld [vmem:[#allocation5 + $0x40] sm:$0xff]   ;;  %v466_v24 = vunpack.c.h.s8.bf16 %v456_v11  ;;  %s2696_s27 = sshll.u32 %s2780_s17, 4  ;;  %s2697_s27 = int_to_ptr.vmem [resolvable:$false] %s2696_s27 }
  0x8a   : > { %2002 = vmatpush3.bf16.msra.mxu0 %v2361_v3  ;;  %v2371_v17 = vld [vmem:[#allocation5 + $0x8] sm:$0xff]   ;;  %2128 = vmatpush3.bf16.msra.mxu1 %v2374_v15  ;;  %v2373_v20 = vld [vmem:[#allocation5] sm:$0xff]   ;;  %v458_v25 = vld [vmem:[%s3019_s24 + $0x18] sm:$0xff]  ;;  %p2694_p0 = pnand %p2693_p10, %p3381_p11  ;;  %s2698_s30 = scalar_lea.vmem %s2697_s27, 4096 }
  0x8b   : > { %2003 = vmatprep.subr.bf16.mxu0 %v2362_v4  ;;  %639 = vmatprep.mubr.bf16.mxu0 %v464_v12  ;;  %v2376_v19 = vld [vmem:[#allocation7 + $0x28] sm:$0xff]   ;;  %v455_v21 = vld [vmem:[%s3019_s24] sm:$0xff]  ;;  %v468_v27 = vunpack.c.l.s8.bf16 %v458_v25  ;;  %v457_v28 = vld [vmem:[%s3019_s24 + $0x10] sm:$0xff]  ;;  %v470_v30 = vunpack.c.h.s8.bf16 %v458_v25  ;;  %p2699_p5 = scmp.lt.s32.totalorder %s3297_s6, %s2697_s27  ;;  %p2700_p9 = scmp.lt.s32.totalorder %s2698_s30, %s2692_s20 }
  0x8c   : > { %2129 = vmatprep.subr.bf16.mxu1 %v2375_v16  ;;  %v2377_v22 = vld [vmem:[#allocation7 + $0x20] sm:$0xff]   ;;  %v463_v23 = vunpack.c.l.s8.bf16 %v455_v21  ;;  %v465_v26 = vunpack.c.h.s8.bf16 %v455_v21  ;;  %v467_v29 = vunpack.c.l.s8.bf16 %v457_v28  ;;  %v460_v31 = vld [vmem:[%s3019_s24 + $0x28] sm:$0xff]  ;;  %v469_v32 = vunpack.c.h.s8.bf16 %v457_v28  ;;  %v462_v37 = vld [vmem:[%s3019_s24 + $0x38] sm:$0xff]  ;;  %p2695_p13 = pneg %p2694_p0 }
  0x8d   : > { %v472_v33 = vunpack.c.l.s8.bf16 %v460_v31  ;;  %v459_v34 = vld [vmem:[%s3019_s24 + $0x20] sm:$0xff]  ;;  %v474_v36 = vunpack.c.h.s8.bf16 %v460_v31  ;;  %v476_v39 = vunpack.c.l.s8.bf16 %v462_v37  ;;  %v461_v40 = vld [vmem:[%s3019_s24 + $0x30] sm:$0xff]  ;;  %v478_v42 = vunpack.c.h.s8.bf16 %v462_v37  ;;  %v2378_v44 = vld [vmem:[#allocation7 + $0x18] sm:$0xff]   ;;  %p2701_p1 = por %p2700_p9, %p2699_p5 }
  0x8e   : > { %2004 = vmatpush3.bf16.msra.mxu0 %v2363_v5  ;;  %2130 = vmatpush3.bf16.msra.mxu1 %v2375_v16  ;;  %v471_v35 = vunpack.c.l.s8.bf16 %v459_v34  ;;  %v473_v38 = vunpack.c.h.s8.bf16 %v459_v34  ;;  %v475_v41 = vunpack.c.l.s8.bf16 %v461_v40  ;;  %v477_v43 = vunpack.c.h.s8.bf16 %v461_v40  ;;  %v2379_v45 = vld [vmem:[#allocation7 + $0x10] sm:$0xff]   ;;  %v2380_v46 = vld [vmem:[#allocation7 + $0x8] sm:$0xff]   ;;  %v2381_v47 = vld [vmem:[#allocation7] sm:$0xff]  }
  0x8f   : > { %2005 = vmatprep.subr.bf16.mxu0 %v2364_v6  ;;  %2131 = vmatprep.subr.bf16.mxu1 %v2376_v19  ;;  %v2382_v40 = vld [vmem:[#allocation8 + $0x38] sm:$0xff]   ;;  %p2702_p3 = pnand %p2701_p1, %p2695_p13 }
  0x92   : > { %2006 = vmatpush3.bf16.msra.mxu0 %v2365_v7  ;;  %2132 = vmatpush3.bf16.msra.mxu1 %v2376_v19 }
  0x93   : > { %2007 = vmatprep.subr.bf16.mxu0 %v2366_v8  ;;  %2133 = vmatprep.subr.bf16.mxu1 %v2377_v22 }
  0x96   : > { %2008 = vmatpush3.bf16.msra.mxu0 %v2367_v9  ;;  %2134 = vmatpush3.bf16.msra.mxu1 %v2377_v22 }
  0x97   : > { %2009 = vmatprep.subr.bf16.mxu0 %v2368_v10  ;;  %2135 = vmatprep.subr.bf16.mxu1 %v2378_v44 }
  0x9a   : > { %2010 = vmatpush3.bf16.msra.mxu0 %v2369_v13  ;;  %2136 = vmatpush3.bf16.msra.mxu1 %v2378_v44  ;;  %v2386_v44 = vld [vmem:[#allocation8 + $0x18] sm:$0xff]  }
  0x9b   : > { %2011 = vmatprep.subr.bf16.mxu0 %v2370_v14  ;;  %2137 = vmatprep.subr.bf16.mxu1 %v2379_v45 }
  0x9e   : > { %2012 = vmatpush3.bf16.msra.mxu0 %v2371_v17  ;;  %2138 = vmatpush3.bf16.msra.mxu1 %v2379_v45  ;;  %v2387_v45 = vld [vmem:[#allocation8 + $0x10] sm:$0xff]  }
  0x9f   : > { %2013 = vmatprep.subr.bf16.mxu0 %v2372_v18  ;;  %2139 = vmatprep.subr.bf16.mxu1 %v2380_v46 }
  0xa2   : > { %2014 = vmatpush3.bf16.msra.mxu0 %v2373_v20  ;;  %2140 = vmatpush3.bf16.msra.mxu1 %v2380_v46  ;;  %v2388_v46 = vld [vmem:[#allocation8 + $0x8] sm:$0xff]  }
  0xa3   : > { %2141 = vmatprep.subr.bf16.mxu1 %v2381_v47 }
  0xa5   : > { %640 = vmatmul.mubr.bf16.vlgmr.msra.gmra.mxu0 %v463_v23 }
  0xa6   : > { %647 = vmatprep.mubr.bf16.mxu0 %v466_v24  ;;  %2142 = vmatpush3.bf16.msra.mxu1 %v2381_v47  ;;  %v2389_v47 = vld [vmem:[#allocation8] sm:$0xff]  }
  0xa7   : > { %2159 = vmatprep.subr.bf16.mxu1 %v2382_v40 }
  0xad   : > { %648 = vmatmul.mubr.bf16.gmra.mxu0 %v465_v26 }
  0xae   : > { %655 = vmatprep.mubr.bf16.mxu0 %v468_v27 }
  0xb5   : > { %656 = vmatmul.mubr.bf16.gmra.mxu0 %v467_v29 }
  0xb6   : > { %663 = vmatprep.mubr.bf16.mxu0 %v470_v30 }
  0xbd   : > { %664 = vmatmul.mubr.bf16.gmra.mxu0 %v469_v32 }
  0xbe   : > { %671 = vmatprep.mubr.bf16.mxu0 %v472_v33 }
  0xc5   : > { %672 = vmatmul.mubr.bf16.gmra.mxu0 %v471_v35 }
  0xc6   : > { %679 = vmatprep.mubr.bf16.mxu0 %v474_v36 }
  0xcd   : > { %680 = vmatmul.mubr.bf16.gmra.mxu0 %v473_v38 }
  0xce   : > { %687 = vmatprep.mubr.bf16.mxu0 %v476_v39 }
  0xd5   : > { %688 = vmatmul.mubr.bf16.gmra.mxu0 %v475_v41  ;;  %v2383_v41 = vld [vmem:[#allocation8 + $0x30] sm:$0xff]  }
  0xd6   : > { %695 = vmatprep.mubr.bf16.mxu0 %v478_v42  ;;  %v2384_v42 = vld [vmem:[#allocation8 + $0x28] sm:$0xff]  }
  0xdd   : > { %696 = vmatmul.mubr.bf16.gmra.mxu0 %v477_v43  ;;  %v2385_v43 = vld [vmem:[#allocation8 + $0x20] sm:$0xff]  }
 0x165   : > { %v2015_v48 = vpop.f32.mrf.mxu0 }
 0x167   : > { %v2016_v49 = vpop.f32.mrf.mxu0 }
 0x168   : > { %v2017_v52 = vadd.f32 %v2016_v49, %v2015_v48  ;;  %v2390_v48 = vld [vmem:[#allocation10 + $0x38] sm:$0xff]   ;;  %v730_v49 = vlaneseq }
 0x169   : > { %v2018_v50 = vpop.f32.mrf.mxu0  ;;  %2191 = vmatprep.subr.bf16.mxu0 %v2390_v48 }
 0x16a   : > { %2192 = vmatpush3.bf16.msra.mxu0 %v2390_v48 }
 0x16b   : > { %v2019_v51 = vpop.f32.mrf.mxu0 }
 0x16c   : > { %v2020_v53 = vadd.f32 %v2019_v51, %v2018_v50  ;;  %v731_v50 = vshrl.u32 %v730_v49, 7  ;;  %v728_v51 = vld [vmem:[%s3346_s3] sm:$0x1] }
 0x16d   : > { %v2021_v54 = vpop.f32.mrf.mxu0 }
 0x16e   : > { %v704_v55 = vpack.c.bf16 %v2020_v53, %v2017_v52  ;;  %v729_v52 = vunpack.c.l.bf16 %v728_v51  ;;  %v3048_v53 = vsub.s32 0, %v731_v50 }
 0x16f   : > { %v2022_v56 = vpop.f32.mrf.mxu0 }
 0x170   : > { %2143 = vmatprep.mubr.bf16.mxu1 %v704_v55  ;;  %v2023_v59 = vadd.f32 %v2022_v56, %v2021_v54  ;;  %v3051_v54 = vrot.slane %v729_v52, %v3048_v53 }
 0x171   : > { %v2024_v57 = vpop.f32.mrf.mxu0 }
 0x173   : > { %v2025_v58 = vpop.f32.mrf.mxu0 }
 0x174   : > { %v2026_v60 = vadd.f32 %v2025_v58, %v2024_v57 }
 0x175   : > { %v2027_v61 = vpop.f32.mrf.mxu0 }
 0x176   : > { %v705_v62 = vpack.c.bf16 %v2026_v60, %v2023_v59 }
 0x177   : > { %v2028_v63 = vpop.f32.mrf.mxu0 }
 0x178   : > { %2144 = vmatmul.mubr.bf16.vlgmr.msra.gmra.mxu1 %v705_v62  ;;  %v2029_v2 = vadd.f32 %v2028_v63, %v2027_v61 }
 0x179   : > { %v2030_v0 = vpop.f32.mrf.mxu0  ;;  %2160 = vmatpush3.bf16.msra.mxu1 %v2382_v40 }
 0x17a   : > { %2161 = vmatprep.subr.bf16.mxu1 %v2383_v41 }
 0x17b   : > { %v2031_v1 = vpop.f32.mrf.mxu0 }
 0x17c   : > { %v2032_v3 = vadd.f32 %v2031_v1, %v2030_v0 }
 0x17d   : > { %v2033_v4 = vpop.f32.mrf.mxu0  ;;  %2162 = vmatpush3.bf16.msra.mxu1 %v2383_v41 }
 0x17e   : > { %v706_v5 = vpack.c.bf16 %v2032_v3, %v2029_v2  ;;  %2163 = vmatprep.subr.bf16.mxu1 %v2384_v42 }
 0x17f   : > { %v2034_v6 = vpop.f32.mrf.mxu0 }
 0x180   : > { %2147 = vmatprep.mubr.bf16.mxu1 %v706_v5  ;;  %v2035_v9 = vadd.f32 %v2034_v6, %v2033_v4 }
 0x181   : > { %v2036_v7 = vpop.f32.mrf.mxu0  ;;  %2164 = vmatpush3.bf16.msra.mxu1 %v2384_v42 }
 0x182   : > { %2165 = vmatprep.subr.bf16.mxu1 %v2385_v43 }
 0x183   : > { %v2037_v8 = vpop.f32.mrf.mxu0 }
 0x184   : > { %v2038_v10 = vadd.f32 %v2037_v8, %v2036_v7 }
 0x185   : > { %v2039_v11 = vpop.f32.mrf.mxu0  ;;  %2166 = vmatpush3.bf16.msra.mxu1 %v2385_v43 }
 0x186   : > { %v707_v12 = vpack.c.bf16 %v2038_v10, %v2035_v9  ;;  %2167 = vmatprep.subr.bf16.mxu1 %v2386_v44 }
 0x187   : > { %v2040_v13 = vpop.f32.mrf.mxu0 }
 0x188   : > { %2148 = vmatmul.mubr.bf16.gmra.mxu1 %v707_v12  ;;  %v2041_v16 = vadd.f32 %v2040_v13, %v2039_v11 }
 0x189   : > { %v2042_v14 = vpop.f32.mrf.mxu0  ;;  %2168 = vmatpush3.bf16.msra.mxu1 %v2386_v44 }
 0x18a   : > { %2169 = vmatprep.subr.bf16.mxu1 %v2387_v45 }
 0x18b   : > { %v2043_v15 = vpop.f32.mrf.mxu0 }
 0x18c   : > { %v2044_v17 = vadd.f32 %v2043_v15, %v2042_v14 }
 0x18d   : > { %v2045_v18 = vpop.f32.mrf.mxu0  ;;  %2170 = vmatpush3.bf16.msra.mxu1 %v2387_v45 }
 0x18e   : > { %v708_v19 = vpack.c.bf16 %v2044_v17, %v2041_v16  ;;  %2171 = vmatprep.subr.bf16.mxu1 %v2388_v46 }
 0x18f   : > { %v2046_v20 = vpop.f32.mrf.mxu0 }
 0x190   : > { %2151 = vmatprep.mubr.bf16.mxu1 %v708_v19  ;;  %v2047_v23 = vadd.f32 %v2046_v20, %v2045_v18 }
 0x191   : > { %v2048_v21 = vpop.f32.mrf.mxu0  ;;  %2172 = vmatpush3.bf16.msra.mxu1 %v2388_v46 }
 0x192   : > { %2173 = vmatprep.subr.bf16.mxu1 %v2389_v47 }
 0x193   : > { %v2049_v22 = vpop.f32.mrf.mxu0 }
 0x194   : > { %v2050_v24 = vadd.f32 %v2049_v22, %v2048_v21 }
 0x195   : > { %v2051_v25 = vpop.f32.mrf.mxu0  ;;  %2174 = vmatpush3.bf16.msra.mxu1 %v2389_v47 }
 0x196   : > { %v709_v26 = vpack.c.bf16 %v2050_v24, %v2047_v23 }
 0x197   : > { %v2052_v27 = vpop.f32.mrf.mxu0 }
 0x198   : > { %2152 = vmatmul.mubr.bf16.gmra.mxu1 %v709_v26  ;;  %v2053_v30 = vadd.f32 %v2052_v27, %v2051_v25 }
 0x199   : > { %v2054_v28 = vpop.f32.mrf.mxu0 }
 0x19b   : > { %v2055_v29 = vpop.f32.mrf.mxu0 }
 0x19c   : > { %v2056_v31 = vadd.f32 %v2055_v29, %v2054_v28 }
 0x19d   : > { %v2057_v32 = vpop.f32.mrf.mxu0 }
 0x19e   : > { %v710_v33 = vpack.c.bf16 %v2056_v31, %v2053_v30 }
 0x19f   : > { %v2058_v34 = vpop.f32.mrf.mxu0 }
 0x1a0   : > { %2155 = vmatprep.mubr.bf16.mxu1 %v710_v33  ;;  %v2059_v37 = vadd.f32 %v2058_v34, %v2057_v32 }
 0x1a1   : > { %v2060_v35 = vpop.f32.mrf.mxu0 }
 0x1a3   : > { %v2061_v36 = vpop.f32.mrf.mxu0 }
 0x1a4   : > { %v2062_v38 = vadd.f32 %v2061_v36, %v2060_v35 }
 0x1a6   : > { %v711_v39 = vpack.c.bf16 %v2062_v38, %v2059_v37 }
 0x1a8   : > { %2156 = vmatmul.mubr.bf16.gmra.mxu1 %v711_v39 }
 0x238   : > { %v2145_v55 = vpop.f32.mrf.mxu1 }
 0x239   : > { %v825_v56 = vadd.f32 %v2145_v55, %v3051_v54 }
 0x23a   : > { %v816_v57 = vpop.f32.mrf.mxu1 }
 0x23b   : > { %v897_v58 = vmin.f32 %v825_v56, 0.0  ;;  %v817_v59 = vadd.f32 %v816_v57, %v3051_v54  ;;  %vm881_vm3 = vcmp.gt.f32.partialorder %v825_v56, 0.0 }
 0x23c   : > { %v2146_v60 = vpop.f32.mrf.mxu1 }
 0x23d   : > { %v915_v61 = vmul.f32 1.442695, %v897_v58  ;;  %v895_v62 = vmin.f32 %v817_v59, 0.0  ;;  %v828_v63 = vadd.f32 %v2146_v60, %v3051_v54  ;;  %vm879_vm1 = vcmp.gt.f32.partialorder %v817_v59, 0.0 }
 0x23e   : > { %v819_v0 = vpop.f32.mrf.mxu1 }
 0x23f   : > { %v911_v1 = vmul.f32 1.442695, %v895_v62  ;;  %v898_v2 = vmin.f32 %v828_v63, 0.0  ;;  %v820_v3 = vadd.f32 %v819_v0, %v3051_v54  ;;  %2406 = vpow2.f32 %v915_v61 }
 0x240   : > { %vm882_vm0 = vcmp.gt.f32.partialorder %v828_v63, 0.0 }
 0x241   : > { %v917_v4 = vmul.f32 1.442695, %v898_v2  ;;  %2408 = vpow2.f32 %v911_v1  ;;  %v896_v5 = vmin.f32 %v820_v3, 0.0  ;;  %vm880_vm2 = vcmp.gt.f32.partialorder %v820_v3, 0.0 }
 0x243   : > { %2410 = vpow2.f32 %v917_v4  ;;  %v913_v6 = vmul.f32 1.442695, %v896_v5 }
 0x245   : > { %2412 = vpow2.f32 %v913_v6 }
 0x248   : > { %v2149_v7 = vpop.f32.mrf.mxu1 }
 0x249   : > { %v3058_v8 = vadd.f32 %v2149_v7, %v3051_v54 }
 0x24a   : > { %v832_v9 = vpop.f32.mrf.mxu1 }
 0x24b   : > { %v901_v10 = vmin.f32 %v3058_v8, 0.0  ;;  %v3062_v11 = vadd.f32 %v832_v9, %v3051_v54  ;;  %vm885_vm7 = vcmp.gt.f32.partialorder %v3058_v8, 0.0 }
 0x24c   : > { %v2150_v12 = vpop.f32.mrf.mxu1  ;;  %v2407_v14 = vpop.eup %2406 }
 0x24d   : > { %v899_v13 = vmin.f32 %v3062_v11, 0.0  ;;  %v923_v15 = vmul.f32 1.442695, %v901_v10  ;;  %v844_v16 = vadd.f32 %v2150_v12, %v3051_v54  ;;  %v1921_v28 = vadd.f32 -1.0, %v2407_v14 }
 0x24e   : > { %v835_v17 = vpop.f32.mrf.mxu1  ;;  %v2409_v18 = vpop.eup %2408  ;;  %vm883_vm5 = vcmp.gt.f32.partialorder %v3062_v11, 0.0 }
 0x24f   : > { %v919_v19 = vmul.f32 1.442695, %v899_v13  ;;  %v836_v20 = vadd.f32 %v835_v17, %v3051_v54  ;;  %v902_v22 = vmin.f32 %v844_v16, 0.0  ;;  %v1919_v26 = vadd.f32 -1.0, %v2409_v18 }
 0x250   : > { %v2411_v21 = vpop.eup %2410  ;;  %v961_v34 = vsel %vm881_vm3, %v825_v56, %v1921_v28  ;;  %vm886_vm4 = vcmp.gt.f32.partialorder %v844_v16, 0.0 }
 0x251   : > { %v1922_v23 = vadd.f32 -1.0, %v2411_v21  ;;  %2414 = vpow2.f32 %v919_v19  ;;  %v900_v24 = vmin.f32 %v836_v20, 0.0  ;;  %v925_v25 = vmul.f32 1.442695, %v902_v22 }
 0x252   : > { %2416 = vpow2.f32 %v923_v15  ;;  %v2413_v27 = vpop.eup %2412  ;;  %v959_v32 = vsel %vm879_vm1, %v817_v59, %v1919_v26  ;;  %vm884_vm6 = vcmp.gt.f32.partialorder %v836_v20, 0.0 }
 0x253   : > { %v921_v29 = vmul.f32 1.442695, %v900_v24  ;;  %2418 = vpow2.f32 %v925_v25  ;;  %v1920_v30 = vadd.f32 -1.0, %v2413_v27  ;;  %v962_v31 = vsel %vm882_vm0, %v828_v63, %v1922_v23 }
 0x254   : > { %v976_v36 = vpack.c.bf16 %v962_v31, %v961_v34 }
 0x255   : > { %2420 = vpow2.f32 %v921_v29  ;;  %v960_v33 = vsel %vm880_vm2, %v820_v3, %v1920_v30 }
 0x256   : > { %v975_v35 = vpack.c.bf16 %v960_v33, %v959_v32 }
 0x258   : > { %v2153_v37 = vpop.f32.mrf.mxu1  ;;  %2175 = vmatprep.mubr.bf16.mxu1 %v975_v35 }
 0x259   : > { %v3068_v38 = vadd.f32 %v2153_v37, %v3051_v54  ;;  %2176 = vmatmul.mubr.bf16.vlgmr.msra.gmra.mxu1 %v976_v36 }
 0x25a   : > { %v848_v39 = vpop.f32.mrf.mxu1 }
 0x25b   : > { %v905_v40 = vmin.f32 %v3068_v38, 0.0  ;;  %v3072_v41 = vadd.f32 %v848_v39, %v3051_v54  ;;  %vm889_vm11 = vcmp.gt.f32.partialorder %v3068_v38, 0.0 }
 0x25c   : > { %v2154_v42 = vpop.f32.mrf.mxu1 }
 0x25d   : > { %v931_v43 = vmul.f32 1.442695, %v905_v40  ;;  %v903_v44 = vmin.f32 %v3072_v41, 0.0  ;;  %v3076_v45 = vadd.f32 %v2154_v42, %v3051_v54  ;;  %vm887_vm9 = vcmp.gt.f32.partialorder %v3072_v41, 0.0 }
 0x25e   : > { %v2415_v46 = vpop.eup %2414  ;;  %v851_v47 = vpop.f32.mrf.mxu1 }
 0x25f   : > { %v2417_v48 = vpop.eup %2416  ;;  %v927_v49 = vmul.f32 1.442695, %v903_v44  ;;  %v906_v50 = vmin.f32 %v3076_v45, 0.0  ;;  %v852_v51 = vadd.f32 %v851_v47, %v3051_v54  ;;  %2422 = vpow2.f32 %v931_v43 }
 0x260   : > { %v2419_v52 = vpop.eup %2418  ;;  %v1923_v56 = vadd.f32 -1.0, %v2415_v46  ;;  %v1925_v59 = vadd.f32 -1.0, %v2417_v48  ;;  %vm890_vm8 = vcmp.gt.f32.partialorder %v3076_v45, 0.0  ;;  %v2391_v48 = vld [vmem:[#allocation10 + $0x30] sm:$0xff]  }
 0x261   : > { %v933_v55 = vmul.f32 1.442695, %v906_v50  ;;  %2424 = vpow2.f32 %v927_v49  ;;  %v904_v58 = vmin.f32 %v852_v51, 0.0  ;;  %v1926_v60 = vadd.f32 -1.0, %v2419_v52  ;;  %2193 = vmatprep.subr.bf16.mxu0 %v2391_v48  ;;  %v2392_v49 = vld [vmem:[#allocation10 + $0x28] sm:$0xff]   ;;  %v2393_v50 = vld [vmem:[#allocation10 + $0x20] sm:$0xff]  }
 0x262   : > { %v2421_v57 = vpop.eup %2420  ;;  %v963_v0 = vsel %vm883_vm5, %v3062_v11, %v1923_v56  ;;  %v965_v3 = vsel %vm885_vm7, %v3058_v8, %v1925_v59  ;;  %vm888_vm10 = vcmp.gt.f32.partialorder %v852_v51, 0.0  ;;  %2194 = vmatpush3.bf16.msra.mxu0 %v2391_v48  ;;  %v2395_v52 = vld [vmem:[#allocation10 + $0x10] sm:$0xff]   ;;  %v2397_v56 = vld [vmem:[#allocation10] sm:$0xff]  }
 0x263   : > { %2426 = vpow2.f32 %v933_v55  ;;  %v1924_v61 = vadd.f32 -1.0, %v2421_v57  ;;  %v929_v62 = vmul.f32 1.442695, %v904_v58  ;;  %v966_v63 = vsel %vm886_vm4, %v844_v16, %v1926_v60  ;;  %2195 = vmatprep.subr.bf16.mxu0 %v2392_v49  ;;  %v2396_v55 = vld [vmem:[#allocation10 + $0x8] sm:$0xff]   ;;  %v999_v57 = vld [vmem:[%s3348_s5] sm:$0x1] }
 0x264   : > { %v978_v4 = vpack.c.bf16 %v966_v63, %v965_v3  ;;  %v1000_v58 = vunpack.c.l.bf16 %v999_v57 }
 0x265   : > { %v964_v1 = vsel %vm884_vm6, %v836_v20, %v1924_v61  ;;  %2428 = vpow2.f32 %v929_v62 }
 0x266   : > { %v977_v2 = vpack.c.bf16 %v964_v1, %v963_v0  ;;  %2196 = vmatpush3.bf16.msra.mxu0 %v2392_v49  ;;  %v3098_v59 = vrot.slane %v1000_v58, %v3048_v53 }
 0x267   : > { %2197 = vmatprep.subr.bf16.mxu0 %v2393_v50 }
 0x268   : > { %v2157_v5 = vpop.f32.mrf.mxu1  ;;  %2179 = vmatprep.mubr.bf16.mxu1 %v977_v2 }
 0x269   : > { %v873_v6 = vadd.f32 %v2157_v5, %v3051_v54  ;;  %2180 = vmatmul.mubr.bf16.gmra.mxu1 %v978_v4 }
 0x26a   : > { %v864_v7 = vpop.f32.mrf.mxu1  ;;  %2198 = vmatpush3.bf16.msra.mxu0 %v2393_v50 }
 0x26b   : > { %v909_v9 = vmin.f32 %v873_v6, 0.0  ;;  %v865_v10 = vadd.f32 %v864_v7, %v3051_v54  ;;  %vm893_vm15 = vcmp.gt.f32.partialorder %v873_v6, 0.0 }
 0x26c   : > { %v2158_v12 = vpop.f32.mrf.mxu1  ;;  %v2423_v15 = vpop.eup %2422 }
 0x26d   : > { %v939_v13 = vmul.f32 1.442695, %v909_v9  ;;  %v907_v14 = vmin.f32 %v865_v10, 0.0  ;;  %v876_v11 = vadd.f32 %v2158_v12, %v3051_v54  ;;  %v1929_v26 = vadd.f32 -1.0, %v2423_v15 }
 0x26e   : > { %v867_v16 = vpop.f32.mrf.mxu1  ;;  %v2425_v17 = vpop.eup %2424  ;;  %vm891_vm13 = vcmp.gt.f32.partialorder %v865_v10, 0.0 }
 0x26f   : > { %v935_v18 = vmul.f32 1.442695, %v907_v14  ;;  %v910_v8 = vmin.f32 %v876_v11, 0.0  ;;  %v868_v20 = vadd.f32 %v867_v16, %v3051_v54  ;;  %2430 = vpow2.f32 %v939_v13 }
 0x270   : > { %v2427_v19 = vpop.eup %2426  ;;  %v1927_v24 = vadd.f32 -1.0, %v2425_v17  ;;  %v969_v32 = vsel %vm889_vm11, %v3068_v38, %v1929_v26  ;;  %vm894_vm12 = vcmp.gt.f32.partialorder %v876_v11, 0.0 }
 0x271   : > { %v941_v21 = vmul.f32 1.442695, %v910_v8  ;;  %v1930_v22 = vadd.f32 -1.0, %v2427_v19  ;;  %2432 = vpow2.f32 %v935_v18  ;;  %v908_v23 = vmin.f32 %v868_v20, 0.0 }
 0x272   : > { %v2429_v25 = vpop.eup %2428  ;;  %v967_v54 = vsel %vm887_vm9, %v3072_v41, %v1927_v24  ;;  %vm892_vm14 = vcmp.gt.f32.partialorder %v868_v20, 0.0 }
 0x273   : > { %2434 = vpow2.f32 %v941_v21  ;;  %v937_v27 = vmul.f32 1.442695, %v908_v23  ;;  %v1928_v28 = vadd.f32 -1.0, %v2429_v25  ;;  %v970_v29 = vsel %vm890_vm8, %v3076_v45, %v1930_v22 }
 0x274   : > { %v980_v33 = vpack.c.bf16 %v970_v29, %v969_v32 }
 0x275   : > { %2436 = vpow2.f32 %v937_v27  ;;  %v968_v30 = vsel %vm888_vm10, %v852_v51, %v1928_v28  ;;  %v2394_v51 = vld [vmem:[#allocation10 + $0x18] sm:$0xff]  }
 0x276   : > { %v979_v31 = vpack.c.bf16 %v968_v30, %v967_v54  ;;  %2199 = vmatprep.subr.bf16.mxu0 %v2394_v51 }
 0x277   : > { %2200 = vmatpush3.bf16.msra.mxu0 %v2394_v51 }
 0x278   : > { %2183 = vmatprep.mubr.bf16.mxu1 %v979_v31  ;;  %2201 = vmatprep.subr.bf16.mxu0 %v2395_v52 }
 0x279   : > { %2184 = vmatmul.mubr.bf16.gmra.mxu1 %v980_v33 }
 0x27b   : > { %2202 = vmatpush3.bf16.msra.mxu0 %v2395_v52 }
 0x27c   : > { %v2431_v34 = vpop.eup %2430  ;;  %2203 = vmatprep.subr.bf16.mxu0 %v2396_v55 }
 0x27d   : > { %v1933_v42 = vadd.f32 -1.0, %v2431_v34 }
 0x27e   : > { %v2433_v35 = vpop.eup %2432 }
 0x27f   : > { %v1931_v39 = vadd.f32 -1.0, %v2433_v35  ;;  %v973_v38 = vsel %vm893_vm15, %v873_v6, %v1933_v42  ;;  %2204 = vmatpush3.bf16.msra.mxu0 %v2396_v55 }
 0x280   : > { %v2435_v36 = vpop.eup %2434  ;;  %2205 = vmatprep.subr.bf16.mxu0 %v2397_v56 }
 0x281   : > { %v1934_v37 = vadd.f32 -1.0, %v2435_v36  ;;  %v971_v41 = vsel %vm891_vm13, %v865_v10, %v1931_v39 }
 0x282   : > { %v2437_v40 = vpop.eup %2436 }
 0x283   : > { %v1932_v43 = vadd.f32 -1.0, %v2437_v40  ;;  %v974_v44 = vsel %vm894_vm12, %v876_v11, %v1934_v37  ;;  %2206 = vmatpush3.bf16.msra.mxu0 %v2397_v56 }
 0x284   : > { %v982_v47 = vpack.c.bf16 %v974_v44, %v973_v38 }
 0x285   : > { %v972_v45 = vsel %vm892_vm14, %v868_v20, %v1932_v43 }
 0x286   : > { %v981_v46 = vpack.c.bf16 %v972_v45, %v971_v41 }
 0x288   : > { %2187 = vmatprep.mubr.bf16.mxu1 %v981_v46 }
 0x289   : > { %2188 = vmatmul.mubr.bf16.gmra.mxu1 %v982_v47 }
 0x319   : > { %v2177_v60 = vpop.f32.mrf.mxu1 }
 0x31a   : > { %v1096_v61 = vadd.f32 %v2177_v60, %v3098_v59 }
 0x31b   : > { %v1087_v62 = vpop.f32.mrf.mxu1 }
 0x31c   : > { %v1168_v63 = vmin.f32 %v1096_v61, 0.0  ;;  %v1088_v0 = vadd.f32 %v1087_v62, %v3098_v59  ;;  %vm1152_vm3 = vcmp.gt.f32.partialorder %v1096_v61, 0.0 }
 0x31d   : > { %v2178_v1 = vpop.f32.mrf.mxu1 }
 0x31e   : > { %v1186_v2 = vmul.f32 1.442695, %v1168_v63  ;;  %v1166_v3 = vmin.f32 %v1088_v0, 0.0  ;;  %v1099_v4 = vadd.f32 %v2178_v1, %v3098_v59  ;;  %vm1150_vm1 = vcmp.gt.f32.partialorder %v1088_v0, 0.0 }
 0x31f   : > { %v1090_v5 = vpop.f32.mrf.mxu1 }
 0x320   : > { %v1182_v6 = vmul.f32 1.442695, %v1166_v3  ;;  %v1169_v7 = vmin.f32 %v1099_v4, 0.0  ;;  %v1091_v9 = vadd.f32 %v1090_v5, %v3098_v59  ;;  %2438 = vpow2.f32 %v1186_v2 }
 0x321   : > { %vm1153_vm0 = vcmp.gt.f32.partialorder %v1099_v4, 0.0 }
 0x322   : > { %v1188_v10 = vmul.f32 1.442695, %v1169_v7  ;;  %2440 = vpow2.f32 %v1182_v6  ;;  %v1167_v12 = vmin.f32 %v1091_v9, 0.0  ;;  %vm1151_vm2 = vcmp.gt.f32.partialorder %v1091_v9, 0.0 }
 0x324   : > { %2442 = vpow2.f32 %v1188_v10  ;;  %v1184_v13 = vmul.f32 1.442695, %v1167_v12 }
 0x326   : > { %2444 = vpow2.f32 %v1184_v13 }
 0x329   : > { %v2181_v14 = vpop.f32.mrf.mxu1 }
 0x32a   : > { %v3105_v11 = vadd.f32 %v2181_v14, %v3098_v59 }
 0x32b   : > { %v1103_v15 = vpop.f32.mrf.mxu1 }
 0x32c   : > { %v1172_v16 = vmin.f32 %v3105_v11, 0.0  ;;  %v3109_v17 = vadd.f32 %v1103_v15, %v3098_v59  ;;  %vm1156_vm7 = vcmp.gt.f32.partialorder %v3105_v11, 0.0 }
 0x32d   : > { %v2182_v18 = vpop.f32.mrf.mxu1  ;;  %v2439_v22 = vpop.eup %2438 }
 0x32e   : > { %v1194_v8 = vmul.f32 1.442695, %v1172_v16  ;;  %v1170_v19 = vmin.f32 %v3109_v17, 0.0  ;;  %v3113_v20 = vadd.f32 %v2182_v18, %v3098_v59  ;;  %v1945_v32 = vadd.f32 -1.0, %v2439_v22 }
 0x32f   : > { %v1106_v21 = vpop.f32.mrf.mxu1  ;;  %v2441_v25 = vpop.eup %2440  ;;  %vm1154_vm5 = vcmp.gt.f32.partialorder %v3109_v17, 0.0 }
 0x330   : > { %v1190_v23 = vmul.f32 1.442695, %v1170_v19  ;;  %v1173_v24 = vmin.f32 %v3113_v20, 0.0  ;;  %v1107_v26 = vadd.f32 %v1106_v21, %v3098_v59  ;;  %2446 = vpow2.f32 %v1194_v8 }
 0x331   : > { %v2443_v27 = vpop.eup %2442  ;;  %v1943_v30 = vadd.f32 -1.0, %v2441_v25  ;;  %v3123_v39 = vsel %vm1152_vm3, %v1096_v61, %v1945_v32  ;;  %vm1157_vm4 = vcmp.gt.f32.partialorder %v3113_v20, 0.0 }
 0x332   : > { %v1196_v28 = vmul.f32 1.442695, %v1173_v24  ;;  %v1946_v29 = vadd.f32 -1.0, %v2443_v27  ;;  %2448 = vpow2.f32 %v1190_v23  ;;  %v1171_v54 = vmin.f32 %v1107_v26, 0.0 }
 0x333   : > { %v2445_v31 = vpop.eup %2444  ;;  %v3119_v36 = vsel %vm1150_vm1, %v1088_v0, %v1943_v30  ;;  %vm1155_vm6 = vcmp.gt.f32.partialorder %v1107_v26, 0.0 }
 0x334   : > { %2450 = vpow2.f32 %v1196_v28  ;;  %v1192_v33 = vmul.f32 1.442695, %v1171_v54  ;;  %v1944_v34 = vadd.f32 -1.0, %v2445_v31  ;;  %v3117_v35 = vsel %vm1153_vm0, %v1099_v4, %v1946_v29 }
 0x335   : > { %v1247_v42 = vpack.c.bf16 %v3117_v35, %v3123_v39 }
 0x336   : > { %2452 = vpow2.f32 %v1192_v33  ;;  %v3121_v37 = vsel %vm1151_vm2, %v1091_v9, %v1944_v34 }
 0x337   : > { %v1246_v40 = vpack.c.bf16 %v3121_v37, %v3119_v36 }
 0x339   : > { %v2185_v43 = vpop.f32.mrf.mxu1  ;;  %2207 = vmatprep.mubr.bf16.mxu0 %v1246_v40 }
 0x33a   : > { %v3130_v44 = vadd.f32 %v2185_v43, %v3098_v59  ;;  %2208 = vmatmul.mubr.bf16.vlgmr.msra.gmra.mxu0 %v1247_v42 }
 0x33b   : > { %v1119_v41 = vpop.f32.mrf.mxu1 }
 0x33c   : > { %v1176_v45 = vmin.f32 %v3130_v44, 0.0  ;;  %v3134_v46 = vadd.f32 %v1119_v41, %v3098_v59  ;;  %vm1160_vm11 = vcmp.gt.f32.partialorder %v3130_v44, 0.0 }
 0x33d   : > { %v2186_v38 = vpop.f32.mrf.mxu1  ;;  %v2447_v47 = vpop.eup %2446 }
 0x33e   : > { %v1202_v48 = vmul.f32 1.442695, %v1176_v45  ;;  %v1174_v49 = vmin.f32 %v3134_v46, 0.0  ;;  %v1131_v50 = vadd.f32 %v2186_v38, %v3098_v59  ;;  %v1949_v1 = vadd.f32 -1.0, %v2447_v47 }
 0x33f   : > { %v2449_v51 = vpop.eup %2448  ;;  %v1122_v52 = vpop.f32.mrf.mxu1  ;;  %vm1158_vm9 = vcmp.gt.f32.partialorder %v3134_v46, 0.0 }
 0x340   : > { %v1198_v56 = vmul.f32 1.442695, %v1174_v49  ;;  %v1177_v57 = vmin.f32 %v1131_v50, 0.0  ;;  %v1123_v58 = vadd.f32 %v1122_v52, %v3098_v59  ;;  %2454 = vpow2.f32 %v1202_v48 }
 0x341   : > { %v2451_v55 = vpop.eup %2450  ;;  %v1947_v62 = vadd.f32 -1.0, %v2449_v51  ;;  %v3153_v9 = vsel %vm1156_vm7, %v3105_v11, %v1949_v1  ;;  %vm1161_vm8 = vcmp.gt.f32.partialorder %v1131_v50, 0.0  ;;  %v2404_v1 = vld [vmem:[#allocation11 + $0x8] sm:$0xff]  }
 0x342   : > { %v1950_v60 = vadd.f32 -1.0, %v2451_v55  ;;  %v1204_v61 = vmul.f32 1.442695, %v1177_v57  ;;  %2456 = vpow2.f32 %v1198_v56  ;;  %v1175_v0 = vmin.f32 %v1123_v58, 0.0 }
 0x343   : > { %v2453_v63 = vpop.eup %2452  ;;  %v3146_v5 = vsel %vm1154_vm5, %v3109_v17, %v1947_v62  ;;  %vm1159_vm10 = vcmp.gt.f32.partialorder %v1123_v58, 0.0  ;;  %v2401_v62 = vld [vmem:[#allocation11 + $0x20] sm:$0xff]  }
 0x344   : > { %2458 = vpow2.f32 %v1204_v61  ;;  %v1948_v2 = vadd.f32 -1.0, %v2453_v63  ;;  %v1200_v3 = vmul.f32 1.442695, %v1175_v0  ;;  %v3142_v4 = vsel %vm1157_vm4, %v3113_v20, %v1950_v60  ;;  %v2399_v60 = vld [vmem:[#allocation11 + $0x30] sm:$0xff]   ;;  %v2400_v61 = vld [vmem:[#allocation11 + $0x28] sm:$0xff]   ;;  %v2402_v63 = vld [vmem:[#allocation11 + $0x18] sm:$0xff]  }
 0x345   : > { %v1249_v10 = vpack.c.bf16 %v3142_v4, %v3153_v9  ;;  %v2403_v0 = vld [vmem:[#allocation11 + $0x10] sm:$0xff]  }
 0x346   : > { %v3148_v6 = vsel %vm1155_vm6, %v1107_v26, %v1948_v2  ;;  %2460 = vpow2.f32 %v1200_v3  ;;  %v2405_v2 = vld [vmem:[#allocation11] sm:$0xff]  }
 0x347   : > { %v1248_v7 = vpack.c.bf16 %v3148_v6, %v3146_v5  ;;  %v1270_v3 = vld [vmem:[%s3350_s7] sm:$0x1] }
 0x349   : > { %v2189_v12 = vpop.f32.mrf.mxu1  ;;  %2211 = vmatprep.mubr.bf16.mxu0 %v1248_v7  ;;  %v1271_v7 = vunpack.c.l.bf16 %v1270_v3 }
 0x34a   : > { %v1144_v13 = vadd.f32 %v2189_v12, %v3098_v59  ;;  %2212 = vmatmul.mubr.bf16.gmra.mxu0 %v1249_v10 }
 0x34b   : > { %v1135_v14 = vpop.f32.mrf.mxu1  ;;  %v3193_v10 = vrot.slane %v1271_v7, %v3048_v53 }
 0x34c   : > { %v1180_v15 = vmin.f32 %v1144_v13, 0.0  ;;  %v1136_v16 = vadd.f32 %v1135_v14, %v3098_v59  ;;  %vm1164_vm15 = vcmp.gt.f32.partialorder %v1144_v13, 0.0 }
 0x34d   : > { %v2190_v17 = vpop.f32.mrf.mxu1  ;;  %v2455_v20 = vpop.eup %2454 }
 0x34e   : > { %v1210_v18 = vmul.f32 1.442695, %v1180_v15  ;;  %v1178_v8 = vmin.f32 %v1136_v16, 0.0  ;;  %v1147_v19 = vadd.f32 %v2190_v17, %v3098_v59  ;;  %v1953_v30 = vadd.f32 -1.0, %v2455_v20 }
 0x34f   : > { %v1138_v11 = vpop.f32.mrf.mxu1  ;;  %v2457_v21 = vpop.eup %2456  ;;  %vm1162_vm13 = vcmp.gt.f32.partialorder %v1136_v16, 0.0 }
 0x350   : > { %v1206_v22 = vmul.f32 1.442695, %v1178_v8  ;;  %v1181_v23 = vmin.f32 %v1147_v19, 0.0  ;;  %v1139_v25 = vadd.f32 %v1138_v11, %v3098_v59  ;;  %2462 = vpow2.f32 %v1210_v18 }
 0x351   : > { %v2459_v24 = vpop.eup %2458  ;;  %v1951_v29 = vadd.f32 -1.0, %v2457_v21  ;;  %v3173_v42 = vsel %vm1160_vm11, %v3130_v44, %v1953_v30  ;;  %vm1165_vm12 = vcmp.gt.f32.partialorder %v1147_v19, 0.0 }
 0x352   : > { %v1212_v26 = vmul.f32 1.442695, %v1181_v23  ;;  %v1954_v27 = vadd.f32 -1.0, %v2459_v24  ;;  %2464 = vpow2.f32 %v1206_v22  ;;  %v1179_v28 = vmin.f32 %v1139_v25, 0.0 }
 0x353   : > { %v2461_v54 = vpop.eup %2460  ;;  %v3166_v59 = vsel %vm1158_vm9, %v3134_v46, %v1951_v29  ;;  %vm1163_vm14 = vcmp.gt.f32.partialorder %v1139_v25, 0.0 }
 0x354   : > { %2466 = vpow2.f32 %v1212_v26  ;;  %v1208_v31 = vmul.f32 1.442695, %v1179_v28  ;;  %v1952_v32 = vadd.f32 -1.0, %v2461_v54  ;;  %v3162_v33 = vsel %vm1161_vm8, %v1131_v50, %v1954_v27 }
 0x355   : > { %v1251_v43 = vpack.c.bf16 %v3162_v33, %v3173_v42 }
 0x356   : > { %2468 = vpow2.f32 %v1208_v31  ;;  %v3168_v34 = vsel %vm1159_vm10, %v1123_v58, %v1952_v32  ;;  %v2398_v58 = vld [vmem:[#allocation11 + $0x38] sm:$0xff]  }
 0x357   : > { %v1250_v40 = vpack.c.bf16 %v3168_v34, %v3166_v59  ;;  %2223 = vmatprep.subr.bf16.mxu1 %v2398_v58 }
 0x358   : > { %2224 = vmatpush3.bf16.msra.mxu1 %v2398_v58 }
 0x359   : > { %2215 = vmatprep.mubr.bf16.mxu0 %v1250_v40  ;;  %2225 = vmatprep.subr.bf16.mxu1 %v2399_v60 }
 0x35a   : > { %2216 = vmatmul.mubr.bf16.gmra.mxu0 %v1251_v43 }
 0x35c   : > { %2226 = vmatpush3.bf16.msra.mxu1 %v2399_v60 }
 0x35d   : > { %v2463_v41 = vpop.eup %2462  ;;  %2227 = vmatprep.subr.bf16.mxu1 %v2400_v61 }
 0x35e   : > { %v1957_v49 = vadd.f32 -1.0, %v2463_v41 }
 0x35f   : > { %v2465_v45 = vpop.eup %2464 }
 0x360   : > { %v1955_v48 = vadd.f32 -1.0, %v2465_v45  ;;  %v3185_v56 = vsel %vm1164_vm15, %v1144_v13, %v1957_v49  ;;  %2228 = vmatpush3.bf16.msra.mxu1 %v2400_v61 }
 0x361   : > { %v2467_v38 = vpop.eup %2466  ;;  %2229 = vmatprep.subr.bf16.mxu1 %v2401_v62 }
 0x362   : > { %v1958_v47 = vadd.f32 -1.0, %v2467_v38  ;;  %v3179_v44 = vsel %vm1162_vm13, %v1136_v16, %v1955_v48 }
 0x363   : > { %v2469_v46 = vpop.eup %2468 }
 0x364   : > { %v1956_v50 = vadd.f32 -1.0, %v2469_v46  ;;  %v3177_v51 = vsel %vm1165_vm12, %v1147_v19, %v1958_v47  ;;  %2230 = vmatpush3.bf16.msra.mxu1 %v2401_v62 }
 0x365   : > { %v1253_v57 = vpack.c.bf16 %v3177_v51, %v3185_v56  ;;  %2231 = vmatprep.subr.bf16.mxu1 %v2402_v63 }
 0x366   : > { %v3181_v52 = vsel %vm1163_vm14, %v1139_v25, %v1956_v50 }
 0x367   : > { %v1252_v55 = vpack.c.bf16 %v3181_v52, %v3179_v44 }
 0x368   : > { %2232 = vmatpush3.bf16.msra.mxu1 %v2402_v63 }
 0x369   : > { %2219 = vmatprep.mubr.bf16.mxu0 %v1252_v55  ;;  %2233 = vmatprep.subr.bf16.mxu1 %v2403_v0 }
 0x36a   : > { %2220 = vmatmul.mubr.bf16.gmra.mxu0 %v1253_v57 }
 0x36c   : > { %2234 = vmatpush3.bf16.msra.mxu1 %v2403_v0 }
 0x36d   : > { %2235 = vmatprep.subr.bf16.mxu1 %v2404_v1 }
 0x370   : > { %2236 = vmatpush3.bf16.msra.mxu1 %v2404_v1 }
 0x371   : > { %2237 = vmatprep.subr.bf16.mxu1 %v2405_v2 }
 0x374   : > { %2238 = vmatpush3.bf16.msra.mxu1 %v2405_v2 }
 0x3fa   : > { %v2209_v12 = vpop.f32.mrf.mxu0 }
 0x3fb   : > { %v1367_v13 = vadd.f32 %v2209_v12, %v3193_v10 }
 0x3fc   : > { %v1358_v14 = vpop.f32.mrf.mxu0 }
 0x3fd   : > { %v1439_v15 = vmin.f32 %v1367_v13, 0.0  ;;  %v1359_v16 = vadd.f32 %v1358_v14, %v3193_v10  ;;  %vm1423_vm3 = vcmp.gt.f32.partialorder %v1367_v13, 0.0 }
 0x3fe   : > { %v2210_v17 = vpop.f32.mrf.mxu0 }
 0x3ff   : > { %v1457_v18 = vmul.f32 1.442695, %v1439_v15  ;;  %v1437_v8 = vmin.f32 %v1359_v16, 0.0  ;;  %v1370_v19 = vadd.f32 %v2210_v17, %v3193_v10  ;;  %vm1421_vm1 = vcmp.gt.f32.partialorder %v1359_v16, 0.0 }
 0x400   : > { %v1361_v20 = vpop.f32.mrf.mxu0 }
 0x401   : > { %v1453_v11 = vmul.f32 1.442695, %v1437_v8  ;;  %v1440_v21 = vmin.f32 %v1370_v19, 0.0  ;;  %v1362_v22 = vadd.f32 %v1361_v20, %v3193_v10  ;;  %2470 = vpow2.f32 %v1457_v18 }
 0x402   : > { %vm1424_vm0 = vcmp.gt.f32.partialorder %v1370_v19, 0.0 }
 0x403   : > { %v1459_v23 = vmul.f32 1.442695, %v1440_v21  ;;  %2472 = vpow2.f32 %v1453_v11  ;;  %v1438_v24 = vmin.f32 %v1362_v22, 0.0  ;;  %vm1422_vm2 = vcmp.gt.f32.partialorder %v1362_v22, 0.0 }
 0x405   : > { %2474 = vpow2.f32 %v1459_v23  ;;  %v1455_v25 = vmul.f32 1.442695, %v1438_v24 }
 0x407   : > { %2476 = vpow2.f32 %v1455_v25 }
 0x40a   : > { %v2213_v26 = vpop.f32.mrf.mxu0 }
 0x40b   : > { %v3200_v27 = vadd.f32 %v2213_v26, %v3193_v10 }
 0x40c   : > { %v1374_v28 = vpop.f32.mrf.mxu0 }
 0x40d   : > { %v1443_v29 = vmin.f32 %v3200_v27, 0.0  ;;  %v3204_v54 = vadd.f32 %v1374_v28, %v3193_v10  ;;  %vm1427_vm7 = vcmp.gt.f32.partialorder %v3200_v27, 0.0 }
 0x40e   : > { %v2214_v30 = vpop.f32.mrf.mxu0  ;;  %v2471_v41 = vpop.eup %2470 }
 0x40f   : > { %v1465_v31 = vmul.f32 1.442695, %v1443_v29  ;;  %v1441_v32 = vmin.f32 %v3204_v54, 0.0  ;;  %v3208_v40 = vadd.f32 %v2214_v30, %v3193_v10  ;;  %v1969_v60 = vadd.f32 -1.0, %v2471_v41 }
 0x410   : > { %v1377_v43 = vpop.f32.mrf.mxu0  ;;  %v2473_v47 = vpop.eup %2472  ;;  %vm1425_vm5 = vcmp.gt.f32.partialorder %v3204_v54, 0.0 }
 0x411   : > { %v1461_v45 = vmul.f32 1.442695, %v1441_v32  ;;  %v1444_v38 = vmin.f32 %v3208_v40, 0.0  ;;  %v1378_v48 = vadd.f32 %v1377_v43, %v3193_v10  ;;  %2478 = vpow2.f32 %v1465_v31 }
 0x412   : > { %v2475_v46 = vpop.eup %2474  ;;  %v1967_v57 = vadd.f32 -1.0, %v2473_v47  ;;  %v1503_v2 = vsel %vm1423_vm3, %v1367_v13, %v1969_v60  ;;  %vm1428_vm4 = vcmp.gt.f32.partialorder %v3208_v40, 0.0 }
 0x413   : > { %v1467_v49 = vmul.f32 1.442695, %v1444_v38  ;;  %v1970_v50 = vadd.f32 -1.0, %v2475_v46  ;;  %2480 = vpow2.f32 %v1461_v45  ;;  %v1442_v55 = vmin.f32 %v1378_v48, 0.0 }
 0x414   : > { %v2477_v58 = vpop.eup %2476  ;;  %v1501_v0 = vsel %vm1421_vm1, %v1359_v16, %v1967_v57  ;;  %vm1426_vm6 = vcmp.gt.f32.partialorder %v1378_v48, 0.0 }
 0x415   : > { %2482 = vpow2.f32 %v1467_v49  ;;  %v1463_v61 = vmul.f32 1.442695, %v1442_v55  ;;  %v1968_v62 = vadd.f32 -1.0, %v2477_v58  ;;  %v1504_v63 = vsel %vm1424_vm0, %v1370_v19, %v1970_v50 }
 0x416   : > { %v1518_v7 = vpack.c.bf16 %v1504_v63, %v1503_v2 }
 0x417   : > { %2484 = vpow2.f32 %v1463_v61  ;;  %v1502_v1 = vsel %vm1422_vm2, %v1362_v22, %v1968_v62 }
 0x418   : > { %v1517_v3 = vpack.c.bf16 %v1502_v1, %v1501_v0 }
 0x41a   : > { %v2217_v12 = vpop.f32.mrf.mxu0  ;;  %2239 = vmatprep.mubr.bf16.mxu1 %v1517_v3 }
 0x41b   : > { %v3213_v14 = vadd.f32 %v2217_v12, %v3193_v10  ;;  %2240 = vmatmul.mubr.bf16.vlgmr.msra.gmra.mxu1 %v1518_v7 }
 0x41c   : > { %v1390_v15 = vpop.f32.mrf.mxu0 }
 0x41d   : > { %v1447_v17 = vmin.f32 %v3213_v14, 0.0  ;;  %v3217_v18 = vadd.f32 %v1390_v15, %v3193_v10  ;;  %vm1431_vm11 = vcmp.gt.f32.partialorder %v3213_v14, 0.0 }
 0x41e   : > { %v2218_v8 = vpop.f32.mrf.mxu0  ;;  %v2479_v19 = vpop.eup %2478 }
 0x41f   : > { %v1473_v20 = vmul.f32 1.442695, %v1447_v17  ;;  %v1445_v16 = vmin.f32 %v3217_v18, 0.0  ;;  %v1402_v13 = vadd.f32 %v2218_v8, %v3193_v10  ;;  %v1973_v32 = vadd.f32 -1.0, %v2479_v19 }
 0x420   : > { %v2481_v11 = vpop.eup %2480  ;;  %v1393_v21 = vpop.f32.mrf.mxu0  ;;  %vm1429_vm9 = vcmp.gt.f32.partialorder %v3217_v18, 0.0 }
 0x421   : > { %v1469_v23 = vmul.f32 1.442695, %v1445_v16  ;;  %v1448_v24 = vmin.f32 %v1402_v13, 0.0  ;;  %v1394_v25 = vadd.f32 %v1393_v21, %v3193_v10  ;;  %2486 = vpow2.f32 %v1473_v20 }
 0x422   : > { %v2483_v22 = vpop.eup %2482  ;;  %v1971_v29 = vadd.f32 -1.0, %v2481_v11  ;;  %v1507_v49 = vsel %vm1427_vm7, %v3200_v27, %v1973_v32  ;;  %vm1432_vm8 = vcmp.gt.f32.partialorder %v1402_v13, 0.0 }
 0x423   : > { %v1974_v26 = vadd.f32 -1.0, %v2483_v22  ;;  %v1475_v28 = vmul.f32 1.442695, %v1448_v24  ;;  %2488 = vpow2.f32 %v1469_v23  ;;  %v1446_v31 = vmin.f32 %v1394_v25, 0.0 }
 0x424   : > { %v2485_v30 = vpop.eup %2484  ;;  %v1505_v38 = vsel %vm1425_vm5, %v3204_v54, %v1971_v29  ;;  %vm1430_vm10 = vcmp.gt.f32.partialorder %v1394_v25, 0.0 }
 0x425   : > { %2490 = vpow2.f32 %v1475_v28  ;;  %v1972_v43 = vadd.f32 -1.0, %v2485_v30  ;;  %v1471_v41 = vmul.f32 1.442695, %v1446_v31  ;;  %v1508_v45 = vsel %vm1428_vm4, %v3208_v40, %v1974_v26 }
 0x426   : > { %v1520_v50 = vpack.c.bf16 %v1508_v45, %v1507_v49 }
 0x427   : > { %v1506_v47 = vsel %vm1426_vm6, %v1378_v48, %v1972_v43  ;;  %2492 = vpow2.f32 %v1471_v41 }
 0x428   : > { %v1519_v46 = vpack.c.bf16 %v1506_v47, %v1505_v38 }
 0x42a   : > { %v2221_v55 = vpop.f32.mrf.mxu0  ;;  %2243 = vmatprep.mubr.bf16.mxu1 %v1519_v46  ;;  %v1541_v46 = vld [vmem:[%s3352_s9] sm:$0x1] }
 0x42b   : > { %v1415_v57 = vadd.f32 %v2221_v55, %v3193_v10  ;;  %2244 = vmatmul.mubr.bf16.gmra.mxu1 %v1520_v50  ;;  %v1542_v49 = vunpack.c.l.bf16 %v1541_v46 }
 0x42c   : > { %v1406_v58 = vpop.f32.mrf.mxu0 }
 0x42d   : > { %v1451_v60 = vmin.f32 %v1415_v57, 0.0  ;;  %v1407_v61 = vadd.f32 %v1406_v58, %v3193_v10  ;;  %vm1435_vm15 = vcmp.gt.f32.partialorder %v1415_v57, 0.0  ;;  %v3240_v50 = vrot.slane %v1542_v49, %v3048_v53 }
 0x42e   : > { %v2222_v40 = vpop.f32.mrf.mxu0  ;;  %v2487_v48 = vpop.eup %2486 }
 0x42f   : > { %v1481_v62 = vmul.f32 1.442695, %v1451_v60  ;;  %v1449_v63 = vmin.f32 %v1407_v61, 0.0  ;;  %v1418_v54 = vadd.f32 %v2222_v40, %v3193_v10  ;;  %v1977_v20 = vadd.f32 -1.0, %v2487_v48 }
 0x430   : > { %v1409_v0 = vpop.f32.mrf.mxu0  ;;  %v2489_v1 = vpop.eup %2488  ;;  %vm1433_vm13 = vcmp.gt.f32.partialorder %v1407_v61, 0.0 }
 0x431   : > { %v1477_v2 = vmul.f32 1.442695, %v1449_v63  ;;  %v1452_v27 = vmin.f32 %v1418_v54, 0.0  ;;  %v1410_v7 = vadd.f32 %v1409_v0, %v3193_v10  ;;  %2494 = vpow2.f32 %v1481_v62 }
 0x432   : > { %v2491_v3 = vpop.eup %2490  ;;  %v1975_v8 = vadd.f32 -1.0, %v2489_v1  ;;  %v1511_v24 = vsel %vm1431_vm11, %v3213_v14, %v1977_v20  ;;  %vm1436_vm12 = vcmp.gt.f32.partialorder %v1418_v54, 0.0 }
 0x433   : > { %v1483_v12 = vmul.f32 1.442695, %v1452_v27  ;;  %v1978_v15 = vadd.f32 -1.0, %v2491_v3  ;;  %2496 = vpow2.f32 %v1477_v2  ;;  %v1450_v17 = vmin.f32 %v1410_v7, 0.0 }
 0x434   : > { %v2493_v19 = vpop.eup %2492  ;;  %v1509_v10 = vsel %vm1429_vm9, %v3217_v18, %v1975_v8  ;;  %vm1434_vm14 = vcmp.gt.f32.partialorder %v1410_v7, 0.0 }
 0x435   : > { %2498 = vpow2.f32 %v1483_v12  ;;  %v1479_v16 = vmul.f32 1.442695, %v1450_v17  ;;  %v1976_v11 = vadd.f32 -1.0, %v2493_v19  ;;  %v1512_v21 = vsel %vm1432_vm8, %v1402_v13, %v1978_v15 }
 0x436   : > { %v1522_v26 = vpack.c.bf16 %v1512_v21, %v1511_v24 }
 0x437   : > { %2500 = vpow2.f32 %v1479_v16  ;;  %v1510_v22 = vsel %vm1430_vm10, %v1394_v25, %v1976_v11 }
 0x438   : > { %v1521_v23 = vpack.c.bf16 %v1510_v22, %v1509_v10 }
 0x43a   : > { %2247 = vmatprep.mubr.bf16.mxu1 %v1521_v23 }
 0x43b   : > { %2248 = vmatmul.mubr.bf16.gmra.mxu1 %v1522_v26 }
 0x43e   : > { %v2495_v28 = vpop.eup %2494 }
 0x43f   : > { %v1981_v41 = vadd.f32 -1.0, %v2495_v28 }
 0x440   : > { %v2497_v29 = vpop.eup %2496 }
 0x441   : > { %v1979_v32 = vadd.f32 -1.0, %v2497_v29  ;;  %v1515_v14 = vsel %vm1435_vm15, %v1415_v57, %v1981_v41 }
 0x442   : > { %v2499_v30 = vpop.eup %2498 }
 0x443   : > { %v1982_v31 = vadd.f32 -1.0, %v2499_v30  ;;  %v1513_v18 = vsel %vm1433_vm13, %v1407_v61, %v1979_v32 }
 0x444   : > { %v2501_v43 = vpop.eup %2500 }
 0x445   : > { %v1980_v13 = vadd.f32 -1.0, %v2501_v43  ;;  %v1516_v45 = vsel %vm1436_vm12, %v1418_v54, %v1982_v31 }
 0x446   : > { %v1524_v47 = vpack.c.bf16 %v1516_v45, %v1515_v14 }
 0x447   : > { %v1514_v25 = vsel %vm1434_vm14, %v1410_v7, %v1980_v13 }
 0x448   : > { %v1523_v38 = vpack.c.bf16 %v1514_v25, %v1513_v18 }
 0x44a   : > { %2251 = vmatprep.mubr.bf16.mxu1 %v1523_v38 }
 0x44b   : > { %2252 = vmatmul.mubr.bf16.gmra.mxu1 %v1524_v47 }
 0x4db   : > { %v2241_v55 = vpop.f32.mrf.mxu1 }
 0x4dc   : > { %v1638_v58 = vadd.f32 %v2241_v55, %v3240_v50 }
 0x4dd   : > { %v1629_v60 = vpop.f32.mrf.mxu1 }
 0x4de   : > { %2502 = vtanh.f32 %v1638_v58  ;;  %v1630_v61 = vadd.f32 %v1629_v60, %v3240_v50 }
 0x4df   : > { %v2242_v57 = vpop.f32.mrf.mxu1 }
 0x4e0   : > { %2504 = vtanh.f32 %v1630_v61  ;;  %v1641_v40 = vadd.f32 %v2242_v57, %v3240_v50 }
 0x4e1   : > { %v1632_v62 = vpop.f32.mrf.mxu1 }
 0x4e2   : > { %2506 = vtanh.f32 %v1641_v40  ;;  %v1633_v63 = vadd.f32 %v1632_v62, %v3240_v50 }
 0x4e4   : > { %2508 = vtanh.f32 %v1633_v63 }
 0x4eb   : > { %v2245_v54 = vpop.f32.mrf.mxu1  ;;  %v2503_v53 = vpop.eup %2502 }
 0x4ec   : > { %v1654_v48 = vadd.f32 %v2245_v54, %v3240_v50  ;;  %v1710_v0 = vadd.f32 %v2503_v53, %v3123_v39 }
 0x4ed   : > { %v1645_v1 = vpop.f32.mrf.mxu1  ;;  %v2505_v2 = vpop.eup %2504 }
 0x4ee   : > { %2510 = vtanh.f32 %v1654_v48  ;;  %v1646_v27 = vadd.f32 %v1645_v1, %v3240_v50  ;;  %1726 = vst [vmem:[%s3250_s2 + $0x10] sm:$0xff] %v1710_v0  ;;  %v1708_v3 = vadd.f32 %v2505_v2, %v3119_v36 }
 0x4ef   : > { %v2246_v7 = vpop.f32.mrf.mxu1  ;;  %v2507_v12 = vpop.eup %2506 }
 0x4f0   : > { %2512 = vtanh.f32 %v1646_v27  ;;  %v1657_v15 = vadd.f32 %v2246_v7, %v3240_v50  ;;  %1724 = vst [vmem:[%s3250_s2] sm:$0xff] %v1708_v3  ;;  %v1711_v39 = vadd.f32 %v2507_v12, %v3117_v35 }
 0x4f1   : > { %v1648_v17 = vpop.f32.mrf.mxu1  ;;  %v2509_v8 = vpop.eup %2508 }
 0x4f2   : > { %2514 = vtanh.f32 %v1657_v15  ;;  %v1649_v19 = vadd.f32 %v1648_v17, %v3240_v50  ;;  %1727 = vst [vmem:[%s3250_s2 + $0x18] sm:$0xff] %v1711_v39  ;;  %v1709_v20 = vadd.f32 %v2509_v8, %v3121_v37 }
 0x4f4   : > { %2516 = vtanh.f32 %v1649_v19  ;;  %1725 = vst [vmem:[%s3250_s2 + $0x8] sm:$0xff] %v1709_v20 }
 0x4fb   : > { %v2511_v36 = vpop.eup %2510  ;;  %v2249_v11 = vpop.f32.mrf.mxu1 }
 0x4fc   : > { %v1714_v16 = vadd.f32 %v2511_v36, %v3153_v9  ;;  %v1670_v10 = vadd.f32 %v2249_v11, %v3240_v50 }
 0x4fd   : > { %v2513_v21 = vpop.eup %2512  ;;  %v1661_v22 = vpop.f32.mrf.mxu1 }
 0x4fe   : > { %1730 = vst [vmem:[%s3250_s2 + $0x30] sm:$0xff] %v1714_v16  ;;  %v1712_v35 = vadd.f32 %v2513_v21, %v3146_v5  ;;  %2518 = vtanh.f32 %v1670_v10  ;;  %v1662_v24 = vadd.f32 %v1661_v22, %v3240_v50 }
 0x4ff   : > { %v2515_v23 = vpop.eup %2514  ;;  %v2250_v26 = vpop.f32.mrf.mxu1 }
 0x500   : > { %1728 = vst [vmem:[%s3250_s2 + $0x20] sm:$0xff] %v1712_v35  ;;  %v1715_v37 = vadd.f32 %v2515_v23, %v3142_v4  ;;  %2520 = vtanh.f32 %v1662_v24  ;;  %v1673_v9 = vadd.f32 %v2250_v26, %v3240_v50 }
 0x501   : > { %v2517_v28 = vpop.eup %2516  ;;  %v1664_v30 = vpop.f32.mrf.mxu1 }
 0x502   : > { %1731 = vst [vmem:[%s3250_s2 + $0x38] sm:$0xff] %v1715_v37  ;;  %v1713_v29 = vadd.f32 %v2517_v28, %v3148_v6  ;;  %2522 = vtanh.f32 %v1673_v9  ;;  %v1665_v5 = vadd.f32 %v1664_v30, %v3240_v50 }
 0x504   : > { %1729 = vst [vmem:[%s3250_s2 + $0x28] sm:$0xff] %v1713_v29  ;;  %2524 = vtanh.f32 %v1665_v5 }
 0x50b   : > { %v2519_v31 = vpop.eup %2518  ;;  %v2253_v32 = vpop.f32.mrf.mxu1 }
 0x50c   : > { %v1718_v4 = vadd.f32 %v2519_v31, %v3173_v42  ;;  %v1686_v43 = vadd.f32 %v2253_v32, %v3240_v50 }
 0x50d   : > { %v2521_v41 = vpop.eup %2520  ;;  %v1677_v13 = vpop.f32.mrf.mxu1 }
 0x50e   : > { %1734 = vst [vmem:[%s3250_s2 + $0x50] sm:$0xff] %v1718_v4  ;;  %v1716_v6 = vadd.f32 %v2521_v41, %v3166_v59  ;;  %2526 = vtanh.f32 %v1686_v43  ;;  %v1678_v45 = vadd.f32 %v1677_v13, %v3240_v50 }
 0x50f   : > { %v2523_v18 = vpop.eup %2522  ;;  %v2254_v25 = vpop.f32.mrf.mxu1 }
 0x510   : > { %1732 = vst [vmem:[%s3250_s2 + $0x40] sm:$0xff] %v1716_v6  ;;  %v1719_v38 = vadd.f32 %v2523_v18, %v3162_v33  ;;  %2528 = vtanh.f32 %v1678_v45  ;;  %v1689_v42 = vadd.f32 %v2254_v25, %v3240_v50 }
 0x511   : > { %v2525_v14 = vpop.eup %2524  ;;  %v1680_v47 = vpop.f32.mrf.mxu1 }
 0x512   : > { %1735 = vst [vmem:[%s3250_s2 + $0x58] sm:$0xff] %v1719_v38  ;;  %v1717_v59 = vadd.f32 %v2525_v14, %v3168_v34  ;;  %2530 = vtanh.f32 %v1689_v42  ;;  %v1681_v46 = vadd.f32 %v1680_v47, %v3240_v50 }
 0x514   : > { %1733 = vst [vmem:[%s3250_s2 + $0x48] sm:$0xff] %v1717_v59  ;;  %2532 = vtanh.f32 %v1681_v46 }
 0x51b   : > { %v2527_v49 = vpop.eup %2526 }
 0x51c   : > { %v1722_v33 = vadd.f32 %v2527_v49, %v3185_v56 }
 0x51d   : > { %v2529_v55 = vpop.eup %2528 }
 0x51e   : > { %1738 = vst [vmem:[%s3250_s2 + $0x70] sm:$0xff] %v1722_v33  ;;  %v1720_v58 = vadd.f32 %v2529_v55, %v3179_v44 }
 0x51f   : > { %v2531_v60 = vpop.eup %2530 }
 0x520   : > { %1736 = vst [vmem:[%s3250_s2 + $0x60] sm:$0xff] %v1720_v58  ;;  %v1723_v34 = vadd.f32 %v2531_v60, %v3177_v51 }
 0x521   : > { %v2533_v50 = vpop.eup %2532 }
 0x522   : > { %1739 = vst [vmem:[%s3250_s2 + $0x78] sm:$0xff] %v1723_v34  ;;  %v1721_v44 = vadd.f32 %v2533_v50, %v3181_v52 }
 0x524   : > { %1737 = vst [vmem:[%s3250_s2 + $0x68] sm:$0xff] %v1721_v44 }
 0x525   : > { %2705 = shalt.err (!%p2702_p3)
}
 0x526   : > { %s2706_s23 = scalar_lea.hbm %s3295_s1, 2048  ;;  %s2710_s21 = scalar_lea.hbm %s3353_s10, 4096 }
 0x527   : > { %p2707_p4 = scmp.ne.s32.totalorder %s3295_s1, %s2706_s23  ;;  %p2711_p2 = scmp.lt.s32.totalorder %s3295_s1, %s3353_s10 }
 0x528   : > { %p2712_p7 = scmp.lt.s32.totalorder %s2710_s21, %s2706_s23 }
 0x529   : > { %p2708_p12 = pnand %p2707_p4, %p3381_p11 }
 0x52a   : > { %p2713_p8 = por %p2712_p7, %p2711_p2 }
 0x52b   : > { %p2709_p6 = pneg %p2708_p12 }
 0x52d   : > { %p2714_p10 = pnand %p2713_p8, %p2709_p6 }
 0x52f   : > { %2717 = shalt.err (!%p2714_p10)
}
 0x530   : > { %s2781_s25 = smov 128   ;;  %s2782_s24 = smov 8  }
 0x531   : > { %2277 = dma.vmem_to_hbm [thread:$0]  (%p3381_p11), %s3297_s6, 2048, %s3295_s1, %s1741_s19, %s2781_s25, %s2781_s25, %s2782_s24  }
 0x532 PF: > { %s1769_s20 = sand.u32 1, %s2756_s13   ;;  %p3382_p0 = scmp.ne.s32.totalorder %s3371_s12, 0 }
 0x533   : > { %p3383_p13 = scmp.ge.s32.totalorder %s2768_s16, 2  ;;  %s1770_s17 = scalar_lea.sflag [#allocation4], %s1769_s20 }
 0x535   : > { %p2300_p5 = pnand %p3383_p13, %p3382_p0 }
 0x537   : > { %p2301_p9 = pneg %p2300_p5 }
 0x539   : > { %2751 = dma.done.wait (%p2301_p9), %s1770_s17, 2048  }
 0x53a   : > { %2753 = vsyncadd (%p2301_p9), %s1770_s17, 4294965248  ;;  %p26_p1 = scmp.ge.s32.totalorder %s2949_s26, 4   ;;  %s3384_s13 = smov %s2760_s14 }
 0x53b   : > { %s3385_s14 = smov %s2764_s15  ;;  %s3386_s15 = smov %s2961_s11 }
 0x53c   : > { %s3387_s16 = smov %s2949_s26  ;;  %28 = sbr.rel (!%p26_p1) target bundleno = 13 (0xd), region = 125 }
 0x541   :  { %1775 = vsyncpa [#allocation3], 1 }
 0x542   :  { %1777 = vsyncpa [#allocation3 + $0x1], 1 }
 0x543   :  { %1778 = vsyncpa [#allocation6], 1 }
 0x544   :  { %1779 = vsyncpa [#allocation9], 1 }
 0x545   :  { %1780 = vsyncpa [#allocation12], 1 }
 0x546   :  { %1781 = vsyncpa [#allocation4], 1 }
 0x547   :  { %1783 = vsyncpa [#allocation4 + $0x1], 1 }

</bundles_post_ra>
